<compile_context>
chip_gen: v7x
topology: tpu7x:2x2x1
jax: 0.10.0
libtpu: 0.0.40
codegen_flags: <defaults>
</compile_context>

<pallas_src>
import functools

import jax
import jax.numpy as jnp
from jax.experimental import pallas as pl
from jax.experimental.pallas import tpu as pltpu


# ----------------------------------------------------------------------------
# Pallas kernel: fused  (patches @ W) + bias + LeakyReLU
# ----------------------------------------------------------------------------
def _conv_mm_kernel(p_ref, w_ref, b_ref, o_ref, *, leaky):
    """One tile of the im2col conv matmul.

    p_ref: (tile, 9*Cin)   bf16 patch rows (one row per output pixel)
    w_ref: (9*Cin, Cout)   bf16 folded conv(+BN) weights
    b_ref: (1, Cout)       f32 folded bias
    o_ref: (tile, Cout)    f32 output
    """
    acc = jnp.dot(p_ref[...], w_ref[...], preferred_element_type=jnp.float32)
    acc = acc + b_ref[...]
    if leaky:
        acc = jnp.where(acc >= 0.0, acc, 0.01 * acc)
    o_ref[...] = acc.astype(o_ref.dtype)


# ----------------------------------------------------------------------------
# Wrappers (padding / patch layout / pool / upsample are XLA data movement)
# ----------------------------------------------------------------------------
def _pick_tile(n, cap=256):
    """Largest tile <= cap that divides n (n is always a multiple of 8 here)."""
    t = min(n, cap)
    while n % t != 0:
        t //= 2
    return max(t, 1)


def _im2col(x_nhwc):
    """(B,H,W,Cin) -> (B*H*W, 9*Cin) bf16 patch matrix for 3x3/pad=1/stride=1."""
    B, H, W, C = x_nhwc.shape
    xp = jnp.pad(x_nhwc.astype(jnp.bfloat16), ((0, 0), (1, 1), (1, 1), (0, 0)))
    patches = jnp.concatenate(
        [xp[:, dy:dy + H, dx:dx + W, :] for dy in range(3) for dx in range(3)],
        axis=-1)                                   # (B,H,W,9*C), tap-major cols
    return patches.reshape(B * H * W, 9 * C)


def conv3x3(x_nhwc, w_k, b, *, leaky):
    """3x3 conv (+ folded BN) (+ LeakyReLU) via a single gridded MXU matmul."""
    B, H, W, Cin = x_nhwc.shape
    K, Cout = w_k.shape                            # K == 9*Cin
    N = B * H * W
    patches = _im2col(x_nhwc)
    tile = _pick_tile(N)

    out = pl.pallas_call(
        functools.partial(_conv_mm_kernel, leaky=leaky),
        out_shape=jax.ShapeDtypeStruct((N, Cout), jnp.float32),
        grid=(N // tile,),
        in_specs=[
            pl.BlockSpec((tile, K), lambda i: (i, 0)),     # patch tile
            pl.BlockSpec((K, Cout), lambda i: (0, 0)),     # weights (resident)
            pl.BlockSpec((1, Cout), lambda i: (0, 0)),     # bias    (resident)
        ],
        out_specs=pl.BlockSpec((tile, Cout), lambda i: (i, 0)),
        compiler_params=pltpu.CompilerParams(
            dimension_semantics=("parallel",),
            vmem_limit_bytes=32 * 1024 * 1024),
    )(patches, w_k, b.reshape(1, Cout))
    return out.reshape(B, H, W, Cout)


def avgpool2x2(x_nhwc):
    B, H, W, C = x_nhwc.shape
    return x_nhwc.reshape(B, H // 2, 2, W // 2, 2, C).mean(axis=(2, 4))


def upsample_nearest2x(x_nhwc):
    return jnp.repeat(jnp.repeat(x_nhwc, 2, axis=1), 2, axis=2)


# ----------------------------------------------------------------------------
# Full forward pass
# ----------------------------------------------------------------------------
def ae_forward(x_nchw, enc_params, dec_params, out_params):
    # NOTE: the reference forward computes an `rss` standardization branch
    # whose result is never returned; it is dead code and removed here.

    h = jnp.transpose(x_nchw, (0, 2, 3, 1))        # NCHW -> NHWC

    # encoder: 4 x [conv3x3 + BN(folded) + LeakyReLU + AvgPool2d(2,2)]
    for w_k, b in enc_params:
        h = conv3x3(h, w_k, b, leaky=True)
        h = avgpool2x2(h)
    z_nhwc = h

    # decoder: 4 x [Upsample(2,nearest) + conv3x3 + BN(folded) + LeakyReLU]
    for w_k, b in dec_params:
        h = upsample_nearest2x(h)
        h = conv3x3(h, w_k, b, leaky=True)

    # final conv (16 -> 1), no BN / activation
    w_k, b = out_params
    h = conv3x3(h, w_k, b, leaky=False)

    x_ret = jnp.transpose(h, (0, 3, 1, 2))         # NHWC -> NCHW
    z = jnp.transpose(z_nhwc, (0, 3, 1, 2))
    return x_ret, z


# ----------------------------------------------------------------------------
# Deterministic parameter initialization (BN folded, eval mode, eps=1e-5)
# ----------------------------------------------------------------------------
def init_conv_bn(key, cin, cout, with_bn=True):
    kw, kb, kg, kbe, km, kv = jax.random.split(key, 6)
    w = 0.1 * jax.random.normal(kw, (cout, cin, 3, 3), jnp.float32)  # OIHW
    b = 0.1 * jax.random.normal(kb, (cout,), jnp.float32)
    if with_bn:
        gamma = 1.0 + 0.1 * jax.random.normal(kg, (cout,), jnp.float32)
        beta = 0.1 * jax.random.normal(kbe, (cout,), jnp.float32)
        rmean = 0.1 * jax.random.normal(km, (cout,), jnp.float32)
        rvar = jax.random.uniform(kv, (cout,), jnp.float32, 0.5, 1.5)
        s = gamma / jnp.sqrt(rvar + 1e-5)
        w = w * s[:, None, None, None]
        b = (b - rmean) * s + beta
    # OIHW -> (ky, kx, Cin, Cout) -> (9*Cin, Cout); columns of the patch
    # matrix are ordered (tap-major, cin-minor) to match _im2col.
    w_k = jnp.transpose(w, (2, 3, 1, 0)).reshape(9 * cin, cout)
    return w_k.astype(jnp.bfloat16), b                     # bias stays f32


if __name__ == "__main__":
    key = jax.random.PRNGKey(0)
    keys = jax.random.split(key, 10)

    enc_params = [init_conv_bn(keys[i], 1 if i == 0 else 16, 16)
                  for i in range(4)]
    dec_params = [init_conv_bn(keys[4 + i], 16, 16) for i in range(4)]
    out_params = init_conv_bn(keys[8], 16, 1, with_bn=False)

    # x: (B=2, C=1, H=16, W=16), NCHW like the PyTorch module
    x = jax.random.normal(keys[9], (2, 1, 16, 16), jnp.float32)

    fwd = jax.jit(ae_forward)
    x_ret, z = fwd(x, enc_params, dec_params, out_params)
    jax.block_until_ready((x_ret, z))

    assert x_ret.shape == (2, 1, 16, 16), x_ret.shape
    assert z.shape == (2, 16, 1, 1), z.shape
    assert jnp.all(jnp.isfinite(x_ret)) and jnp.all(jnp.isfinite(z))
    print("KERNEL_OK")
</pallas_src>

<mosaic_0001>
module attributes {stable_mosaic.version = 11 : i64} {
  func.func @_conv_mm_kernel(%arg0: i32, %arg1: memref<256x9xbf16, #tpu.memory_space<vmem>>, %arg2: memref<9x16xbf16, #tpu.memory_space<vmem>>, %arg3: memref<1x16xf32, #tpu.memory_space<vmem>>, %arg4: memref<256x16xf32, #tpu.memory_space<vmem>>) attributes {dimension_semantics = [#tpu.dimension_semantics<parallel>], iteration_bounds = array<i64: 2>, scalar_prefetch = 0 : i64, scratch_operands = 0 : i64, tpu.core_type = #tpu.core_type<tc>, window_params = [{transform_indices = @transform_0, window_bounds = array<i64: 256, 9>}, {pipeline_mode = #tpu.pipeline_mode<synchronous>, transform_indices = @transform_1, window_bounds = array<i64: 9, 16>}, {pipeline_mode = #tpu.pipeline_mode<synchronous>, transform_indices = @transform_2, window_bounds = array<i64: 1, 16>}, {transform_indices = @transform_3, window_bounds = array<i64: 256, 16>}]} {
    %c0 = arith.constant 0 : index
    %c0_0 = arith.constant 0 : index
    %0 = vector.load %arg1[%c0, %c0_0] : memref<256x9xbf16, #tpu.memory_space<vmem>>, vector<256x9xbf16>
    %c0_1 = arith.constant 0 : index
    %c0_2 = arith.constant 0 : index
    %1 = vector.load %arg2[%c0_1, %c0_2] : memref<9x16xbf16, #tpu.memory_space<vmem>>, vector<9x16xbf16>
    %cst = arith.constant dense<0.000000e+00> : vector<256x16xf32>
    %2 = tpu.matmul %0, %1, %cst {dimension_numbers = #tpu.dot_dimension_numbers<[1], [0], [0], [1], [0, 0, 1, 1], [], []>} : vector<256x9xbf16>, vector<9x16xbf16>, vector<256x16xf32> -> vector<256x16xf32>
    %c0_3 = arith.constant 0 : index
    %c0_4 = arith.constant 0 : index
    %3 = vector.load %arg3[%c0_3, %c0_4] : memref<1x16xf32, #tpu.memory_space<vmem>>, vector<1x16xf32>
    %4 = vector.broadcast %3 : vector<1x16xf32> to vector<256x16xf32>
    %5 = arith.addf %2, %4 : vector<256x16xf32>
    %cst_5 = arith.constant 0.000000e+00 : f32
    %6 = vector.broadcast %cst_5 : f32 to vector<256x16xf32>
    %7 = arith.cmpf oge, %5, %6 : vector<256x16xf32>
    %cst_6 = arith.constant 0.00999999977 : f32
    %8 = vector.broadcast %cst_6 : f32 to vector<256x16xf32>
    %9 = arith.mulf %8, %5 : vector<256x16xf32>
    %10 = arith.select %7, %5, %9 : vector<256x16xi1>, vector<256x16xf32>
    %c0_7 = arith.constant 0 : index
    %c0_8 = arith.constant 0 : index
    %11 = vector.load %arg4[%c0_7, %c0_8] : memref<256x16xf32, #tpu.memory_space<vmem>>, vector<256x16xf32>
    tpu.vector_store %arg4[%c0_7, %c0_8], %10 {strides = array<i32>} : memref<256x16xf32, #tpu.memory_space<vmem>>, vector<256x16xf32>,
    return
  }
  func.func @transform_0(%arg0: i32) -> (i32, i32) {
    %c0_i32 = arith.constant 0 : i32
    %c0_i32_0 = arith.constant 0 : i32
    return %arg0, %c0_i32 : i32, i32
  }
  func.func @transform_1(%arg0: i32) -> (i32, i32) {
    %c0_i32 = arith.constant 0 : i32
    %c0_i32_0 = arith.constant 0 : i32
    %c0_i32_1 = arith.constant 0 : i32
    return %c0_i32, %c0_i32_0 : i32, i32
  }
  func.func @transform_2(%arg0: i32) -> (i32, i32) {
    %c0_i32 = arith.constant 0 : i32
    %c0_i32_0 = arith.constant 0 : i32
    %c0_i32_1 = arith.constant 0 : i32
    return %c0_i32, %c0_i32_0 : i32, i32
  }
  func.func @transform_3(%arg0: i32) -> (i32, i32) {
    %c0_i32 = arith.constant 0 : i32
    %c0_i32_0 = arith.constant 0 : i32
    return %arg0, %c0_i32 : i32, i32
  }
}

module attributes {stable_mosaic.version = 11 : i64} {
  func.func @_conv_mm_kernel(%arg0: i32, %arg1: memref<128x144xbf16, #tpu.memory_space<vmem>>, %arg2: memref<144x16xbf16, #tpu.memory_space<vmem>>, %arg3: memref<1x16xf32, #tpu.memory_space<vmem>>, %arg4: memref<128x16xf32, #tpu.memory_space<vmem>>) attributes {dimension_semantics = [#tpu.dimension_semantics<parallel>], iteration_bounds = array<i64: 1>, scalar_prefetch = 0 : i64, scratch_operands = 0 : i64, tpu.core_type = #tpu.core_type<tc>, window_params = [{transform_indices = @transform_0, window_bounds = array<i64: 128, 144>}, {pipeline_mode = #tpu.pipeline_mode<synchronous>, transform_indices = @transform_1, window_bounds = array<i64: 144, 16>}, {pipeline_mode = #tpu.pipeline_mode<synchronous>, transform_indices = @transform_2, window_bounds = array<i64: 1, 16>}, {transform_indices = @transform_3, window_bounds = array<i64: 128, 16>}]} {
    %c0 = arith.constant 0 : index
    %c0_0 = arith.constant 0 : index
    %0 = vector.load %arg1[%c0, %c0_0] : memref<128x144xbf16, #tpu.memory_space<vmem>>, vector<128x144xbf16>
    %c0_1 = arith.constant 0 : index
    %c0_2 = arith.constant 0 : index
    %1 = vector.load %arg2[%c0_1, %c0_2] : memref<144x16xbf16, #tpu.memory_space<vmem>>, vector<144x16xbf16>
    %cst = arith.constant dense<0.000000e+00> : vector<128x16xf32>
    %2 = tpu.matmul %0, %1, %cst {dimension_numbers = #tpu.dot_dimension_numbers<[1], [0], [0], [1], [0, 0, 1, 1], [], []>} : vector<128x144xbf16>, vector<144x16xbf16>, vector<128x16xf32> -> vector<128x16xf32>
    %c0_3 = arith.constant 0 : index
    %c0_4 = arith.constant 0 : index
    %3 = vector.load %arg3[%c0_3, %c0_4] : memref<1x16xf32, #tpu.memory_space<vmem>>, vector<1x16xf32>
    %4 = vector.broadcast %3 : vector<1x16xf32> to vector<128x16xf32>
    %5 = arith.addf %2, %4 : vector<128x16xf32>
    %cst_5 = arith.constant 0.000000e+00 : f32
    %6 = vector.broadcast %cst_5 : f32 to vector<128x16xf32>
    %7 = arith.cmpf oge, %5, %6 : vector<128x16xf32>
    %cst_6 = arith.constant 0.00999999977 : f32
    %8 = vector.broadcast %cst_6 : f32 to vector<128x16xf32>
    %9 = arith.mulf %8, %5 : vector<128x16xf32>
    %10 = arith.select %7, %5, %9 : vector<128x16xi1>, vector<128x16xf32>
    %c0_7 = arith.constant 0 : index
    %c0_8 = arith.constant 0 : index
    %11 = vector.load %arg4[%c0_7, %c0_8] : memref<128x16xf32, #tpu.memory_space<vmem>>, vector<128x16xf32>
    tpu.vector_store %arg4[%c0_7, %c0_8], %10 {strides = array<i32>} : memref<128x16xf32, #tpu.memory_space<vmem>>, vector<128x16xf32>,
    return
  }
  func.func @transform_0(%arg0: i32) -> (i32, i32) {
    %c0_i32 = arith.constant 0 : i32
    %c0_i32_0 = arith.constant 0 : i32
    return %arg0, %c0_i32 : i32, i32
  }
  func.func @transform_1(%arg0: i32) -> (i32, i32) {
    %c0_i32 = arith.constant 0 : i32
    %c0_i32_0 = arith.constant 0 : i32
    %c0_i32_1 = arith.constant 0 : i32
    return %c0_i32, %c0_i32_0 : i32, i32
  }
  func.func @transform_2(%arg0: i32) -> (i32, i32) {
    %c0_i32 = arith.constant 0 : i32
    %c0_i32_0 = arith.constant 0 : i32
    %c0_i32_1 = arith.constant 0 : i32
    return %c0_i32, %c0_i32_0 : i32, i32
  }
  func.func @transform_3(%arg0: i32) -> (i32, i32) {
    %c0_i32 = arith.constant 0 : i32
    %c0_i32_0 = arith.constant 0 : i32
    return %arg0, %c0_i32 : i32, i32
  }
}

module attributes {stable_mosaic.version = 11 : i64} {
  func.func @_conv_mm_kernel(%arg0: i32, %arg1: memref<32x144xbf16, #tpu.memory_space<vmem>>, %arg2: memref<144x16xbf16, #tpu.memory_space<vmem>>, %arg3: memref<1x16xf32, #tpu.memory_space<vmem>>, %arg4: memref<32x16xf32, #tpu.memory_space<vmem>>) attributes {dimension_semantics = [#tpu.dimension_semantics<parallel>], iteration_bounds = array<i64: 1>, scalar_prefetch = 0 : i64, scratch_operands = 0 : i64, tpu.core_type = #tpu.core_type<tc>, window_params = [{transform_indices = @transform_0, window_bounds = array<i64: 32, 144>}, {pipeline_mode = #tpu.pipeline_mode<synchronous>, transform_indices = @transform_1, window_bounds = array<i64: 144, 16>}, {pipeline_mode = #tpu.pipeline_mode<synchronous>, transform_indices = @transform_2, window_bounds = array<i64: 1, 16>}, {transform_indices = @transform_3, window_bounds = array<i64: 32, 16>}]} {
    %c0 = arith.constant 0 : index
    %c0_0 = arith.constant 0 : index
    %0 = vector.load %arg1[%c0, %c0_0] : memref<32x144xbf16, #tpu.memory_space<vmem>>, vector<32x144xbf16>
    %c0_1 = arith.constant 0 : index
    %c0_2 = arith.constant 0 : index
    %1 = vector.load %arg2[%c0_1, %c0_2] : memref<144x16xbf16, #tpu.memory_space<vmem>>, vector<144x16xbf16>
    %cst = arith.constant dense<0.000000e+00> : vector<32x16xf32>
    %2 = tpu.matmul %0, %1, %cst {dimension_numbers = #tpu.dot_dimension_numbers<[1], [0], [0], [1], [0, 0, 1, 1], [], []>} : vector<32x144xbf16>, vector<144x16xbf16>, vector<32x16xf32> -> vector<32x16xf32>
    %c0_3 = arith.constant 0 : index
    %c0_4 = arith.constant 0 : index
    %3 = vector.load %arg3[%c0_3, %c0_4] : memref<1x16xf32, #tpu.memory_space<vmem>>, vector<1x16xf32>
    %4 = vector.broadcast %3 : vector<1x16xf32> to vector<32x16xf32>
    %5 = arith.addf %2, %4 : vector<32x16xf32>
    %cst_5 = arith.constant 0.000000e+00 : f32
    %6 = vector.broadcast %cst_5 : f32 to vector<32x16xf32>
    %7 = arith.cmpf oge, %5, %6 : vector<32x16xf32>
    %cst_6 = arith.constant 0.00999999977 : f32
    %8 = vector.broadcast %cst_6 : f32 to vector<32x16xf32>
    %9 = arith.mulf %8, %5 : vector<32x16xf32>
    %10 = arith.select %7, %5, %9 : vector<32x16xi1>, vector<32x16xf32>
    %c0_7 = arith.constant 0 : index
    %c0_8 = arith.constant 0 : index
    %11 = vector.load %arg4[%c0_7, %c0_8] : memref<32x16xf32, #tpu.memory_space<vmem>>, vector<32x16xf32>
    tpu.vector_store %arg4[%c0_7, %c0_8], %10 {strides = array<i32>} : memref<32x16xf32, #tpu.memory_space<vmem>>, vector<32x16xf32>,
    return
  }
  func.func @transform_0(%arg0: i32) -> (i32, i32) {
    %c0_i32 = arith.constant 0 : i32
    %c0_i32_0 = arith.constant 0 : i32
    return %arg0, %c0_i32 : i32, i32
  }
  func.func @transform_1(%arg0: i32) -> (i32, i32) {
    %c0_i32 = arith.constant 0 : i32
    %c0_i32_0 = arith.constant 0 : i32
    %c0_i32_1 = arith.constant 0 : i32
    return %c0_i32, %c0_i32_0 : i32, i32
  }
  func.func @transform_2(%arg0: i32) -> (i32, i32) {
    %c0_i32 = arith.constant 0 : i32
    %c0_i32_0 = arith.constant 0 : i32
    %c0_i32_1 = arith.constant 0 : i32
    return %c0_i32, %c0_i32_0 : i32, i32
  }
  func.func @transform_3(%arg0: i32) -> (i32, i32) {
    %c0_i32 = arith.constant 0 : i32
    %c0_i32_0 = arith.constant 0 : i32
    return %arg0, %c0_i32 : i32, i32
  }
}

module attributes {stable_mosaic.version = 11 : i64} {
  func.func @_conv_mm_kernel(%arg0: i32, %arg1: memref<8x144xbf16, #tpu.memory_space<vmem>>, %arg2: memref<144x16xbf16, #tpu.memory_space<vmem>>, %arg3: memref<1x16xf32, #tpu.memory_space<vmem>>, %arg4: memref<8x16xf32, #tpu.memory_space<vmem>>) attributes {dimension_semantics = [#tpu.dimension_semantics<parallel>], iteration_bounds = array<i64: 1>, scalar_prefetch = 0 : i64, scratch_operands = 0 : i64, tpu.core_type = #tpu.core_type<tc>, window_params = [{transform_indices = @transform_0, window_bounds = array<i64: 8, 144>}, {pipeline_mode = #tpu.pipeline_mode<synchronous>, transform_indices = @transform_1, window_bounds = array<i64: 144, 16>}, {pipeline_mode = #tpu.pipeline_mode<synchronous>, transform_indices = @transform_2, window_bounds = array<i64: 1, 16>}, {transform_indices = @transform_3, window_bounds = array<i64: 8, 16>}]} {
    %c0 = arith.constant 0 : index
    %c0_0 = arith.constant 0 : index
    %0 = vector.load %arg1[%c0, %c0_0] : memref<8x144xbf16, #tpu.memory_space<vmem>>, vector<8x144xbf16>
    %c0_1 = arith.constant 0 : index
    %c0_2 = arith.constant 0 : index
    %1 = vector.load %arg2[%c0_1, %c0_2] : memref<144x16xbf16, #tpu.memory_space<vmem>>, vector<144x16xbf16>
    %cst = arith.constant dense<0.000000e+00> : vector<8x16xf32>
    %2 = tpu.matmul %0, %1, %cst {dimension_numbers = #tpu.dot_dimension_numbers<[1], [0], [0], [1], [0, 0, 1, 1], [], []>} : vector<8x144xbf16>, vector<144x16xbf16>, vector<8x16xf32> -> vector<8x16xf32>
    %c0_3 = arith.constant 0 : index
    %c0_4 = arith.constant 0 : index
    %3 = vector.load %arg3[%c0_3, %c0_4] : memref<1x16xf32, #tpu.memory_space<vmem>>, vector<1x16xf32>
    %4 = vector.broadcast %3 : vector<1x16xf32> to vector<8x16xf32>
    %5 = arith.addf %2, %4 : vector<8x16xf32>
    %cst_5 = arith.constant 0.000000e+00 : f32
    %6 = vector.broadcast %cst_5 : f32 to vector<8x16xf32>
    %7 = arith.cmpf oge, %5, %6 : vector<8x16xf32>
    %cst_6 = arith.constant 0.00999999977 : f32
    %8 = vector.broadcast %cst_6 : f32 to vector<8x16xf32>
    %9 = arith.mulf %8, %5 : vector<8x16xf32>
    %10 = arith.select %7, %5, %9 : vector<8x16xi1>, vector<8x16xf32>
    %c0_7 = arith.constant 0 : index
    %c0_8 = arith.constant 0 : index
    %11 = vector.load %arg4[%c0_7, %c0_8] : memref<8x16xf32, #tpu.memory_space<vmem>>, vector<8x16xf32>
    tpu.vector_store %arg4[%c0_7, %c0_8], %10 {strides = array<i32>} : memref<8x16xf32, #tpu.memory_space<vmem>>, vector<8x16xf32>,
    return
  }
  func.func @transform_0(%arg0: i32) -> (i32, i32) {
    %c0_i32 = arith.constant 0 : i32
    %c0_i32_0 = arith.constant 0 : i32
    return %arg0, %c0_i32 : i32, i32
  }
  func.func @transform_1(%arg0: i32) -> (i32, i32) {
    %c0_i32 = arith.constant 0 : i32
    %c0_i32_0 = arith.constant 0 : i32
    %c0_i32_1 = arith.constant 0 : i32
    return %c0_i32, %c0_i32_0 : i32, i32
  }
  func.func @transform_2(%arg0: i32) -> (i32, i32) {
    %c0_i32 = arith.constant 0 : i32
    %c0_i32_0 = arith.constant 0 : i32
    %c0_i32_1 = arith.constant 0 : i32
    return %c0_i32, %c0_i32_0 : i32, i32
  }
  func.func @transform_3(%arg0: i32) -> (i32, i32) {
    %c0_i32 = arith.constant 0 : i32
    %c0_i32_0 = arith.constant 0 : i32
    return %arg0, %c0_i32 : i32, i32
  }
}

module attributes {stable_mosaic.version = 11 : i64} {
  func.func @_conv_mm_kernel(%arg0: i32, %arg1: memref<256x144xbf16, #tpu.memory_space<vmem>>, %arg2: memref<144x16xbf16, #tpu.memory_space<vmem>>, %arg3: memref<1x16xf32, #tpu.memory_space<vmem>>, %arg4: memref<256x16xf32, #tpu.memory_space<vmem>>) attributes {dimension_semantics = [#tpu.dimension_semantics<parallel>], iteration_bounds = array<i64: 2>, scalar_prefetch = 0 : i64, scratch_operands = 0 : i64, tpu.core_type = #tpu.core_type<tc>, window_params = [{transform_indices = @transform_0, window_bounds = array<i64: 256, 144>}, {pipeline_mode = #tpu.pipeline_mode<synchronous>, transform_indices = @transform_1, window_bounds = array<i64: 144, 16>}, {pipeline_mode = #tpu.pipeline_mode<synchronous>, transform_indices = @transform_2, window_bounds = array<i64: 1, 16>}, {transform_indices = @transform_3, window_bounds = array<i64: 256, 16>}]} {
    %c0 = arith.constant 0 : index
    %c0_0 = arith.constant 0 : index
    %0 = vector.load %arg1[%c0, %c0_0] : memref<256x144xbf16, #tpu.memory_space<vmem>>, vector<256x144xbf16>
    %c0_1 = arith.constant 0 : index
    %c0_2 = arith.constant 0 : index
    %1 = vector.load %arg2[%c0_1, %c0_2] : memref<144x16xbf16, #tpu.memory_space<vmem>>, vector<144x16xbf16>
    %cst = arith.constant dense<0.000000e+00> : vector<256x16xf32>
    %2 = tpu.matmul %0, %1, %cst {dimension_numbers = #tpu.dot_dimension_numbers<[1], [0], [0], [1], [0, 0, 1, 1], [], []>} : vector<256x144xbf16>, vector<144x16xbf16>, vector<256x16xf32> -> vector<256x16xf32>
    %c0_3 = arith.constant 0 : index
    %c0_4 = arith.constant 0 : index
    %3 = vector.load %arg3[%c0_3, %c0_4] : memref<1x16xf32, #tpu.memory_space<vmem>>, vector<1x16xf32>
    %4 = vector.broadcast %3 : vector<1x16xf32> to vector<256x16xf32>
    %5 = arith.addf %2, %4 : vector<256x16xf32>
    %cst_5 = arith.constant 0.000000e+00 : f32
    %6 = vector.broadcast %cst_5 : f32 to vector<256x16xf32>
    %7 = arith.cmpf oge, %5, %6 : vector<256x16xf32>
    %cst_6 = arith.constant 0.00999999977 : f32
    %8 = vector.broadcast %cst_6 : f32 to vector<256x16xf32>
    %9 = arith.mulf %8, %5 : vector<256x16xf32>
    %10 = arith.select %7, %5, %9 : vector<256x16xi1>, vector<256x16xf32>
    %c0_7 = arith.constant 0 : index
    %c0_8 = arith.constant 0 : index
    %11 = vector.load %arg4[%c0_7, %c0_8] : memref<256x16xf32, #tpu.memory_space<vmem>>, vector<256x16xf32>
    tpu.vector_store %arg4[%c0_7, %c0_8], %10 {strides = array<i32>} : memref<256x16xf32, #tpu.memory_space<vmem>>, vector<256x16xf32>,
    return
  }
  func.func @transform_0(%arg0: i32) -> (i32, i32) {
    %c0_i32 = arith.constant 0 : i32
    %c0_i32_0 = arith.constant 0 : i32
    return %arg0, %c0_i32 : i32, i32
  }
  func.func @transform_1(%arg0: i32) -> (i32, i32) {
    %c0_i32 = arith.constant 0 : i32
    %c0_i32_0 = arith.constant 0 : i32
    %c0_i32_1 = arith.constant 0 : i32
    return %c0_i32, %c0_i32_0 : i32, i32
  }
  func.func @transform_2(%arg0: i32) -> (i32, i32) {
    %c0_i32 = arith.constant 0 : i32
    %c0_i32_0 = arith.constant 0 : i32
    %c0_i32_1 = arith.constant 0 : i32
    return %c0_i32, %c0_i32_0 : i32, i32
  }
  func.func @transform_3(%arg0: i32) -> (i32, i32) {
    %c0_i32 = arith.constant 0 : i32
    %c0_i32_0 = arith.constant 0 : i32
    return %arg0, %c0_i32 : i32, i32
  }
}

module attributes {stable_mosaic.version = 11 : i64} {
  func.func @_conv_mm_kernel(%arg0: i32, %arg1: memref<256x144xbf16, #tpu.memory_space<vmem>>, %arg2: memref<144x1xbf16, #tpu.memory_space<vmem>>, %arg3: memref<1x1xf32, #tpu.memory_space<vmem>>, %arg4: memref<256x1xf32, #tpu.memory_space<vmem>>) attributes {dimension_semantics = [#tpu.dimension_semantics<parallel>], iteration_bounds = array<i64: 2>, scalar_prefetch = 0 : i64, scratch_operands = 0 : i64, tpu.core_type = #tpu.core_type<tc>, window_params = [{transform_indices = @transform_0, window_bounds = array<i64: 256, 144>}, {pipeline_mode = #tpu.pipeline_mode<synchronous>, transform_indices = @transform_1, window_bounds = array<i64: 144, 1>}, {pipeline_mode = #tpu.pipeline_mode<synchronous>, transform_indices = @transform_2, window_bounds = array<i64: 1, 1>}, {transform_indices = @transform_3, window_bounds = array<i64: 256, 1>}]} {
    %c0 = arith.constant 0 : index
    %c0_0 = arith.constant 0 : index
    %0 = vector.load %arg1[%c0, %c0_0] : memref<256x144xbf16, #tpu.memory_space<vmem>>, vector<256x144xbf16>
    %c0_1 = arith.constant 0 : index
    %c0_2 = arith.constant 0 : index
    %1 = vector.load %arg2[%c0_1, %c0_2] : memref<144x1xbf16, #tpu.memory_space<vmem>>, vector<144x1xbf16>
    %cst = arith.constant dense<0.000000e+00> : vector<256x1xf32>
    %2 = tpu.matmul %0, %1, %cst {dimension_numbers = #tpu.dot_dimension_numbers<[1], [0], [0], [1], [0, 0, 1, 1], [], []>} : vector<256x144xbf16>, vector<144x1xbf16>, vector<256x1xf32> -> vector<256x1xf32>
    %c0_3 = arith.constant 0 : index
    %c0_4 = arith.constant 0 : index
    %3 = vector.load %arg3[%c0_3, %c0_4] : memref<1x1xf32, #tpu.memory_space<vmem>>, vector<1x1xf32>
    %4 = vector.broadcast %3 : vector<1x1xf32> to vector<256x1xf32>
    %5 = arith.addf %2, %4 : vector<256x1xf32>
    %c0_5 = arith.constant 0 : index
    %c0_6 = arith.constant 0 : index
    %6 = vector.load %arg4[%c0_5, %c0_6] : memref<256x1xf32, #tpu.memory_space<vmem>>, vector<256x1xf32>
    tpu.vector_store %arg4[%c0_5, %c0_6], %5 {strides = array<i32>} : memref<256x1xf32, #tpu.memory_space<vmem>>, vector<256x1xf32>,
    return
  }
  func.func @transform_0(%arg0: i32) -> (i32, i32) {
    %c0_i32 = arith.constant 0 : i32
    %c0_i32_0 = arith.constant 0 : i32
    return %arg0, %c0_i32 : i32, i32
  }
  func.func @transform_1(%arg0: i32) -> (i32, i32) {
    %c0_i32 = arith.constant 0 : i32
    %c0_i32_0 = arith.constant 0 : i32
    %c0_i32_1 = arith.constant 0 : i32
    return %c0_i32, %c0_i32_0 : i32, i32
  }
  func.func @transform_2(%arg0: i32) -> (i32, i32) {
    %c0_i32 = arith.constant 0 : i32
    %c0_i32_0 = arith.constant 0 : i32
    %c0_i32_1 = arith.constant 0 : i32
    return %c0_i32, %c0_i32_0 : i32, i32
  }
  func.func @transform_3(%arg0: i32) -> (i32, i32) {
    %c0_i32 = arith.constant 0 : i32
    %c0_i32_0 = arith.constant 0 : i32
    return %arg0, %c0_i32 : i32, i32
  }
}

</mosaic_0001>

<bundles_post_ra>
// kernel: ae_forward.9
= control target key start
LH: loop header
LB: loop body
LE: loop exit
PB: predicated region body
PF: predicated region fallthrough
CT: control target
= control target key end

     0   :  { %s856_s12 = smov 0   ;;  %s1017_s0 = inlined_call_operand.vmem [shape: bf16[512,9], index: 0, kind: input, shape index: {}]   ;;  %s1018_s1 = inlined_call_operand.vmem [shape: bf16[9,16], index: 1, kind: input, shape index: {}]   ;;  %s1019_s2 = inlined_call_operand.vmem [shape: f32[1,16], index: 2, kind: input, shape index: {}]   ;;  %s1020_s3 = inlined_call_operand.vmem [shape: f32[512,16], index: 3, kind: output, shape index: {}]  }
   0x1 LB: > { %s703_s13 = sadd.s32 4294967295, %s833_s12   ;;  %p707_p0 = scmp.ge.s32.totalorder %s833_s12, 1  ;;  %s833_s12 = sphi %s856_s12, %s13_s12  }
   0x2   : > { %p138_p1 = scmp.lt.s32.totalorder %s833_s12, 3 }
   0x4   : > { %p139_p2 = pnand %p707_p0, %p138_p1 }
   0x5   : > { %v810_v0 = vld [vmem:[%s1018_s1] sm:$0x1f] (!%p139_p2)   ;;  %vm350_vm0 = vcmask (!%p139_p2), 1043456   ;;  %vm351_vm1 = vcmask (!%p139_p2), 1044480   ;;  %s708_s16 = sshll.u32 (!%p139_p2), %s703_s13, 5  ;;  %v835_v1 = vmov (!%p139_p2), 65535  }
   0x6   : > { %142 = sbr.rel (%p139_p2) target bundleno = 267 (0x10b), region = 32  ;;  %v352_v2 = vsel (!%p139_p2), %vm350_vm0, 4294967295, %v835_v1  ;;  %p163_p3 = scmp.lt.s32.totalorder (!%p139_p2), %s708_s16, 63  ;;  %vm301_vm2 = vcmask (!%p139_p2), 72704   ;;  %v910_v21 = vld [vmem:[%s1019_s2] ss:$0 sm:$0xff] (!%p139_p2) }
   0x7   : > { %v353_v3 = vsel (!%p139_p2), %vm351_vm1, %v352_v2, 0  ;;  %vm614_vm3 = vcmask (!%p139_p2), 130048  }
   0x8   : > { %v355_v4 = vand.u32 (!%p139_p2), %v810_v0, %v353_v3 }
   0xa   : > { %765 = vmatprep.subr.bf16.mxu0 (!%p139_p2), %v355_v4  ;;  %799 = vmatprep.subr.bf16.mxu1 (!%p139_p2), %v355_v4 }
   0xb   : > { %766 = vmatpush3.bf16.msra.mxu0 (!%p139_p2), %v355_v4  ;;  %800 = vmatpush3.bf16.msra.mxu1 (!%p139_p2), %v355_v4 }
   0xd   : > { %s1022_s16 = smov (!%p163_p3, %s708_s16), 63 }
   0xe   : > { %s709_s17 = sshll.u32 %s1022_s16, 2  ;;  %s711_s23 = sshll.u32 %s1022_s16, 3 }
   0xf   : > { %s873_s20 = scalar_lea.vmem %s1017_s0, %s709_s17  ;;  %s919_s26 = scalar_lea.vmem %s1020_s3, %s711_s23 }
  0x10   : > { %v811_v5 = vld [vmem:[%s873_s20] sm:$0xff]   ;;  %v813_v7 = vld [vmem:[%s873_s20 + $0x8] sm:$0xff]   ;;  %v815_v9 = vld [vmem:[%s873_s20 + $0x10] sm:$0xff]  }
  0x11   : > { %v812_v6 = vld [vmem:[%s873_s20 + $0x40] sm:$0xff]   ;;  %767 = vmatprep.mubr.msk.bf16.mxu0 %vm301_vm2, %v811_v5  ;;  %v814_v8 = vld [vmem:[%s873_s20 + $0x48] sm:$0xff]   ;;  %v816_v10 = vld [vmem:[%s873_s20 + $0x50] sm:$0xff]  }
  0x12   : > { %783 = vmatprep.mubr.msk.bf16.mxu1 %vm301_vm2, %v812_v6  ;;  %768 = vmatmul.mubr.msk.bf16.vlgmr.msra.gmra.mrb[0].mxu0 %vm301_vm2, %v813_v7  ;;  %v817_v11 = vld [vmem:[%s873_s20 + $0x18] sm:$0xff]   ;;  %v819_v13 = vld [vmem:[%s873_s20 + $0x20] sm:$0xff]   ;;  %v821_v15 = vld [vmem:[%s873_s20 + $0x28] sm:$0xff]  }
  0x13   : > { %784 = vmatmul.mubr.msk.bf16.vlgmr.msra.gmra.mrb[0].mxu1 %vm301_vm2, %v814_v8  ;;  %771 = vmatprep.mubr.msk.bf16.mxu0 %vm301_vm2, %v815_v9  ;;  %v818_v12 = vld [vmem:[%s873_s20 + $0x58] sm:$0xff]   ;;  %v820_v14 = vld [vmem:[%s873_s20 + $0x60] sm:$0xff]   ;;  %v822_v16 = vld [vmem:[%s873_s20 + $0x68] sm:$0xff]  }
  0x14   : > { %787 = vmatprep.mubr.msk.bf16.mxu1 %vm301_vm2, %v816_v10  ;;  %v823_v17 = vld [vmem:[%s873_s20 + $0x30] sm:$0xff]   ;;  %v825_v19 = vld [vmem:[%s873_s20 + $0x38] sm:$0xff]  }
  0x15   : > { %v824_v18 = vld [vmem:[%s873_s20 + $0x70] sm:$0xff]   ;;  %v826_v20 = vld [vmem:[%s873_s20 + $0x78] sm:$0xff]  }
  0x1a   : > { %772 = vmatmul.mubr.msk.bf16.gmra.mrb[4].mxu0 %vm301_vm2, %v817_v11 }
  0x1b   : > { %788 = vmatmul.mubr.msk.bf16.gmra.mrb[4].mxu1 %vm301_vm2, %v818_v12  ;;  %775 = vmatprep.mubr.msk.bf16.mxu0 %vm301_vm2, %v819_v13 }
  0x1c   : > { %791 = vmatprep.mubr.msk.bf16.mxu1 %vm301_vm2, %v820_v14 }
  0x22   : > { %776 = vmatmul.mubr.msk.bf16.gmra.mrb[8].mxu0 %vm301_vm2, %v821_v15 }
  0x23   : > { %792 = vmatmul.mubr.msk.bf16.gmra.mrb[8].mxu1 %vm301_vm2, %v822_v16  ;;  %779 = vmatprep.mubr.msk.bf16.mxu0 %vm301_vm2, %v823_v17 }
  0x24   : > { %795 = vmatprep.mubr.msk.bf16.mxu1 %vm301_vm2, %v824_v18 }
  0x2a   : > { %780 = vmatmul.mubr.msk.bf16.gmra.mrb[12].mxu0 %vm301_vm2, %v825_v19 }
  0x2b   : > { %796 = vmatmul.mubr.msk.bf16.gmra.mrb[12].mxu1 %vm301_vm2, %v826_v20 }
  0xe5   : > { %v769_v22 = vpop.f32.mrb[0].mxu0 }
  0xe6   : > { %v400_v23 = vadd.f32 %v769_v22, %v910_v21  ;;  %v785_v24 = vpop.f32.mrb[0].mxu1  ;;  %v391_v25 = vpop.f32.mrb[1].mxu0 }
  0xe7   : > { %v464_v26 = vadd.f32 %v785_v24, %v910_v21  ;;  %v392_v27 = vadd.f32 %v910_v21, %v391_v25  ;;  %v455_v28 = vpop.f32.mrb[1].mxu1  ;;  %v770_v29 = vpop.f32.mrb[2].mxu0 }
  0xe8   : > { %vm520_vm4 = vcmp.ge.f32.partialorder %v400_v23, 0.0  ;;  %v552_v30 = vmul.f32 0.01, %v400_v23  ;;  %v456_v31 = vadd.f32 %v910_v21, %v455_v28  ;;  %v403_v32 = vadd.f32 %v770_v29, %v910_v21  ;;  %v786_v33 = vpop.f32.mrb[2].mxu1  ;;  %v394_v34 = vpop.f32.mrb[3].mxu0 }
  0xe9   : > { %vm536_vm5 = vcmp.ge.f32.partialorder %v464_v26, 0.0  ;;  %v568_v35 = vmul.f32 0.01, %v464_v26  ;;  %vm518_vm6 = vcmp.ge.f32.partialorder %v392_v27, 0.0  ;;  %v550_v36 = vmul.f32 0.01, %v392_v27 }
  0xea   : > { %v584_v37 = vsel %vm520_vm4, %v400_v23, %v552_v30  ;;  %vm534_vm7 = vcmp.ge.f32.partialorder %v456_v31, 0.0  ;;  %v566_v38 = vmul.f32 0.01, %v456_v31  ;;  %vm521_vm8 = vcmp.ge.f32.partialorder %v403_v32, 0.0  ;;  %v458_v39 = vpop.f32.mrb[3].mxu1 }
  0xeb   : > { %617 = vst.msk [vmem:[%s919_s26 + $0x10] sm:$0xff] %vm614_vm3, %v584_v37  ;;  %v600_v40 = vsel %vm536_vm5, %v464_v26, %v568_v35  ;;  %v582_v41 = vsel %vm518_vm6, %v392_v27, %v550_v36  ;;  %v553_v42 = vmul.f32 0.01, %v403_v32  ;;  %v467_v43 = vadd.f32 %v786_v33, %v910_v21 }
  0xec   : > { %633 = vst.msk [vmem:[%s919_s26 + $0x90] sm:$0xff] %vm614_vm3, %v600_v40  ;;  %615 = vst.msk [vmem:[%s919_s26] sm:$0xff] %vm614_vm3, %v582_v41  ;;  %v598_v44 = vsel %vm534_vm7, %v456_v31, %v566_v38  ;;  %v395_v45 = vadd.f32 %v910_v21, %v394_v34  ;;  %v459_v46 = vadd.f32 %v910_v21, %v458_v39 }
  0xed   : > { %631 = vst.msk [vmem:[%s919_s26 + $0x80] sm:$0xff] %vm614_vm3, %v598_v44  ;;  %v585_v47 = vsel %vm521_vm8, %v403_v32, %v553_v42  ;;  %vm537_vm9 = vcmp.ge.f32.partialorder %v467_v43, 0.0  ;;  %v569_v48 = vmul.f32 0.01, %v467_v43  ;;  %v773_v49 = vpop.f32.mrb[4].mxu0 }
  0xee   : > { %618 = vst.msk [vmem:[%s919_s26 + $0x18] sm:$0xff] %vm614_vm3, %v585_v47  ;;  %vm519_vm10 = vcmp.ge.f32.partialorder %v395_v45, 0.0  ;;  %v551_v50 = vmul.f32 0.01, %v395_v45  ;;  %vm535_vm11 = vcmp.ge.f32.partialorder %v459_v46, 0.0  ;;  %v416_v53 = vadd.f32 %v773_v49, %v910_v21  ;;  %v789_v54 = vpop.f32.mrb[4].mxu1 }
  0xef   : > { %v567_v51 = vmul.f32 0.01, %v459_v46  ;;  %v601_v52 = vsel %vm537_vm9, %v467_v43, %v569_v48  ;;  %v407_v55 = vpop.f32.mrb[5].mxu0  ;;  %v480_v58 = vadd.f32 %v789_v54, %v910_v21  ;;  %v471_v60 = vpop.f32.mrb[5].mxu1 }
  0xf0   : > { %634 = vst.msk [vmem:[%s919_s26 + $0x98] sm:$0xff] %vm614_vm3, %v601_v52  ;;  %v583_v56 = vsel %vm519_vm10, %v395_v45, %v551_v50  ;;  %v408_v59 = vadd.f32 %v910_v21, %v407_v55  ;;  %v774_v61 = vpop.f32.mrb[6].mxu0  ;;  %vm524_vm12 = vcmp.ge.f32.partialorder %v416_v53, 0.0  ;;  %v556_v62 = vmul.f32 0.01, %v416_v53  ;;  %v790_v1 = vpop.f32.mrb[6].mxu1 }
  0xf1   : > { %v599_v57 = vsel %vm535_vm11, %v459_v46, %v567_v51  ;;  %616 = vst.msk [vmem:[%s919_s26 + $0x8] sm:$0xff] %vm614_vm3, %v583_v56  ;;  %v472_v63 = vadd.f32 %v910_v21, %v471_v60  ;;  %v419_v0 = vadd.f32 %v774_v61, %v910_v21  ;;  %v410_v2 = vpop.f32.mrb[7].mxu0  ;;  %vm540_vm13 = vcmp.ge.f32.partialorder %v480_v58, 0.0  ;;  %v474_v7 = vpop.f32.mrb[7].mxu1 }
  0xf2   : > { %632 = vst.msk [vmem:[%s919_s26 + $0x88] sm:$0xff] %vm614_vm3, %v599_v57  ;;  %v572_v3 = vmul.f32 0.01, %v480_v58  ;;  %vm522_vm14 = vcmp.ge.f32.partialorder %v408_v59, 0.0  ;;  %v554_v4 = vmul.f32 0.01, %v408_v59  ;;  %v588_v5 = vsel %vm524_vm12, %v416_v53, %v556_v62 }
  0xf3   : > { %vm538_vm15 = vcmp.ge.f32.partialorder %v472_v63, 0.0  ;;  %v570_v6 = vmul.f32 0.01, %v472_v63  ;;  %vm525_vm0 = vcmp.ge.f32.partialorder %v419_v0, 0.0  ;;  %621 = vst.msk [vmem:[%s919_s26 + $0x30] sm:$0xff] %vm614_vm3, %v588_v5  ;;  %v483_v11 = vadd.f32 %v790_v1, %v910_v21 }
  0xf4   : > { %v604_v8 = vsel %vm540_vm13, %v480_v58, %v572_v3  ;;  %v586_v9 = vsel %vm522_vm14, %v408_v59, %v554_v4  ;;  %v557_v10 = vmul.f32 0.01, %v419_v0  ;;  %v411_v13 = vadd.f32 %v910_v21, %v410_v2 }
  0xf5   : > { %637 = vst.msk [vmem:[%s919_s26 + $0xb0] sm:$0xff] %vm614_vm3, %v604_v8  ;;  %619 = vst.msk [vmem:[%s919_s26 + $0x20] sm:$0xff] %vm614_vm3, %v586_v9  ;;  %v602_v12 = vsel %vm538_vm15, %v472_v63, %v570_v6  ;;  %v475_v14 = vadd.f32 %v910_v21, %v474_v7  ;;  %v777_v15 = vpop.f32.mrb[8].mxu0  ;;  %vm541_vm1 = vcmp.ge.f32.partialorder %v483_v11, 0.0  ;;  %v573_v17 = vmul.f32 0.01, %v483_v11 }
  0xf6   : > { %635 = vst.msk [vmem:[%s919_s26 + $0xa0] sm:$0xff] %vm614_vm3, %v602_v12  ;;  %v589_v16 = vsel %vm525_vm0, %v419_v0, %v557_v10  ;;  %v432_v18 = vadd.f32 %v777_v15, %v910_v21  ;;  %v793_v19 = vpop.f32.mrb[8].mxu1  ;;  %v423_v20 = vpop.f32.mrb[9].mxu0  ;;  %vm523_vm2 = vcmp.ge.f32.partialorder %v411_v13, 0.0  ;;  %v555_v22 = vmul.f32 0.01, %v411_v13 }
  0xf7   : > { %622 = vst.msk [vmem:[%s919_s26 + $0x38] sm:$0xff] %vm614_vm3, %v589_v16  ;;  %vm539_vm4 = vcmp.ge.f32.partialorder %v475_v14, 0.0  ;;  %v571_v23 = vmul.f32 0.01, %v475_v14  ;;  %v605_v24 = vsel %vm541_vm1, %v483_v11, %v573_v17  ;;  %v496_v26 = vadd.f32 %v793_v19, %v910_v21  ;;  %v487_v27 = vpop.f32.mrb[9].mxu1  ;;  %v778_v28 = vpop.f32.mrb[10].mxu0 }
  0xf8   : > { %vm528_vm5 = vcmp.ge.f32.partialorder %v432_v18, 0.0  ;;  %v560_v25 = vmul.f32 0.01, %v432_v18  ;;  %638 = vst.msk [vmem:[%s919_s26 + $0xb8] sm:$0xff] %vm614_vm3, %v605_v24  ;;  %v587_v29 = vsel %vm523_vm2, %v411_v13, %v555_v22  ;;  %v424_v31 = vadd.f32 %v910_v21, %v423_v20  ;;  %v794_v33 = vpop.f32.mrb[10].mxu1  ;;  %v426_v34 = vpop.f32.mrb[11].mxu0 }
  0xf9   : > { %v603_v30 = vsel %vm539_vm4, %v475_v14, %v571_v23  ;;  %v488_v32 = vadd.f32 %v910_v21, %v487_v27  ;;  %620 = vst.msk [vmem:[%s919_s26 + $0x28] sm:$0xff] %vm614_vm3, %v587_v29  ;;  %vm544_vm6 = vcmp.ge.f32.partialorder %v496_v26, 0.0  ;;  %v576_v36 = vmul.f32 0.01, %v496_v26  ;;  %v490_v38 = vpop.f32.mrb[11].mxu1 }
  0xfa   : > { %636 = vst.msk [vmem:[%s919_s26 + $0xa8] sm:$0xff] %vm614_vm3, %v603_v30  ;;  %v592_v35 = vsel %vm528_vm5, %v432_v18, %v560_v25  ;;  %v435_v37 = vadd.f32 %v778_v28, %v910_v21  ;;  %vm526_vm7 = vcmp.ge.f32.partialorder %v424_v31, 0.0  ;;  %v558_v39 = vmul.f32 0.01, %v424_v31 }
  0xfb   : > { %625 = vst.msk [vmem:[%s919_s26 + $0x50] sm:$0xff] %vm614_vm3, %v592_v35  ;;  %vm542_vm8 = vcmp.ge.f32.partialorder %v488_v32, 0.0  ;;  %v574_v40 = vmul.f32 0.01, %v488_v32  ;;  %v608_v41 = vsel %vm544_vm6, %v496_v26, %v576_v36  ;;  %v499_v43 = vadd.f32 %v794_v33, %v910_v21 }
  0xfc   : > { %vm529_vm9 = vcmp.ge.f32.partialorder %v435_v37, 0.0  ;;  %v561_v42 = vmul.f32 0.01, %v435_v37  ;;  %641 = vst.msk [vmem:[%s919_s26 + $0xd0] sm:$0xff] %vm614_vm3, %v608_v41  ;;  %v590_v44 = vsel %vm526_vm7, %v424_v31, %v558_v39  ;;  %v427_v46 = vadd.f32 %v910_v21, %v426_v34 }
  0xfd   : > { %v606_v45 = vsel %vm542_vm8, %v488_v32, %v574_v40  ;;  %v491_v47 = vadd.f32 %v910_v21, %v490_v38  ;;  %v781_v48 = vpop.f32.mrb[12].mxu0  ;;  %623 = vst.msk [vmem:[%s919_s26 + $0x40] sm:$0xff] %vm614_vm3, %v590_v44  ;;  %vm545_vm10 = vcmp.ge.f32.partialorder %v499_v43, 0.0  ;;  %v577_v50 = vmul.f32 0.01, %v499_v43 }
  0xfe   : > { %639 = vst.msk [vmem:[%s919_s26 + $0xc0] sm:$0xff] %vm614_vm3, %v606_v45  ;;  %v593_v49 = vsel %vm529_vm9, %v435_v37, %v561_v42  ;;  %v448_v51 = vadd.f32 %v781_v48, %v910_v21  ;;  %v797_v52 = vpop.f32.mrb[12].mxu1  ;;  %v439_v53 = vpop.f32.mrb[13].mxu0  ;;  %vm527_vm11 = vcmp.ge.f32.partialorder %v427_v46, 0.0  ;;  %v559_v54 = vmul.f32 0.01, %v427_v46 }
  0xff   : > { %626 = vst.msk [vmem:[%s919_s26 + $0x58] sm:$0xff] %vm614_vm3, %v593_v49  ;;  %vm543_vm12 = vcmp.ge.f32.partialorder %v491_v47, 0.0  ;;  %v575_v55 = vmul.f32 0.01, %v491_v47  ;;  %v609_v56 = vsel %vm545_vm10, %v499_v43, %v577_v50  ;;  %v512_v58 = vadd.f32 %v797_v52, %v910_v21  ;;  %v503_v59 = vpop.f32.mrb[13].mxu1  ;;  %v782_v60 = vpop.f32.mrb[14].mxu0 }
 0x100   : > { %vm532_vm13 = vcmp.ge.f32.partialorder %v448_v51, 0.0  ;;  %v564_v57 = vmul.f32 0.01, %v448_v51  ;;  %642 = vst.msk [vmem:[%s919_s26 + $0xd8] sm:$0xff] %vm614_vm3, %v609_v56  ;;  %v591_v61 = vsel %vm527_vm11, %v427_v46, %v559_v54  ;;  %v440_v63 = vadd.f32 %v910_v21, %v439_v53  ;;  %v798_v1 = vpop.f32.mrb[14].mxu1  ;;  %v442_v2 = vpop.f32.mrb[15].mxu0 }
 0x101   : > { %v607_v62 = vsel %vm543_vm12, %v491_v47, %v575_v55  ;;  %v504_v0 = vadd.f32 %v910_v21, %v503_v59  ;;  %624 = vst.msk [vmem:[%s919_s26 + $0x48] sm:$0xff] %vm614_vm3, %v591_v61  ;;  %vm548_vm14 = vcmp.ge.f32.partialorder %v512_v58, 0.0  ;;  %v580_v4 = vmul.f32 0.01, %v512_v58  ;;  %v506_v6 = vpop.f32.mrb[15].mxu1 }
 0x102   : > { %640 = vst.msk [vmem:[%s919_s26 + $0xc8] sm:$0xff] %vm614_vm3, %v607_v62  ;;  %v596_v3 = vsel %vm532_vm13, %v448_v51, %v564_v57  ;;  %v451_v5 = vadd.f32 %v782_v60, %v910_v21  ;;  %vm530_vm15 = vcmp.ge.f32.partialorder %v440_v63, 0.0  ;;  %v562_v7 = vmul.f32 0.01, %v440_v63 }
 0x103   : > { %629 = vst.msk [vmem:[%s919_s26 + $0x70] sm:$0xff] %vm614_vm3, %v596_v3  ;;  %vm546_vm0 = vcmp.ge.f32.partialorder %v504_v0, 0.0  ;;  %v578_v8 = vmul.f32 0.01, %v504_v0  ;;  %v612_v9 = vsel %vm548_vm14, %v512_v58, %v580_v4  ;;  %v515_v11 = vadd.f32 %v798_v1, %v910_v21 }
 0x104   : > { %vm533_vm1 = vcmp.ge.f32.partialorder %v451_v5, 0.0  ;;  %v565_v10 = vmul.f32 0.01, %v451_v5  ;;  %645 = vst.msk [vmem:[%s919_s26 + $0xf0] sm:$0xff] %vm614_vm3, %v612_v9  ;;  %v594_v12 = vsel %vm530_vm15, %v440_v63, %v562_v7  ;;  %v443_v14 = vadd.f32 %v910_v21, %v442_v2 }
 0x105   : > { %v610_v13 = vsel %vm546_vm0, %v504_v0, %v578_v8  ;;  %v507_v15 = vadd.f32 %v910_v21, %v506_v6  ;;  %627 = vst.msk [vmem:[%s919_s26 + $0x60] sm:$0xff] %vm614_vm3, %v594_v12  ;;  %vm549_vm2 = vcmp.ge.f32.partialorder %v515_v11, 0.0  ;;  %v581_v17 = vmul.f32 0.01, %v515_v11 }
 0x106   : > { %643 = vst.msk [vmem:[%s919_s26 + $0xe0] sm:$0xff] %vm614_vm3, %v610_v13  ;;  %v597_v16 = vsel %vm533_vm1, %v451_v5, %v565_v10  ;;  %vm531_vm4 = vcmp.ge.f32.partialorder %v443_v14, 0.0  ;;  %v563_v18 = vmul.f32 0.01, %v443_v14 }
 0x107   : > { %630 = vst.msk [vmem:[%s919_s26 + $0x78] sm:$0xff] %vm614_vm3, %v597_v16  ;;  %vm547_vm5 = vcmp.ge.f32.partialorder %v507_v15, 0.0  ;;  %v579_v19 = vmul.f32 0.01, %v507_v15  ;;  %v613_v20 = vsel %vm549_vm2, %v515_v11, %v581_v17 }
 0x108   : > { %646 = vst.msk [vmem:[%s919_s26 + $0xf8] sm:$0xff] %vm614_vm3, %v613_v20  ;;  %v595_v22 = vsel %vm531_vm4, %v443_v14, %v563_v18 }
 0x109   : > { %v611_v23 = vsel %vm547_vm5, %v507_v15, %v579_v19  ;;  %628 = vst.msk [vmem:[%s919_s26 + $0x68] sm:$0xff] %vm614_vm3, %v595_v22 }
 0x10a   : > { %644 = vst.msk [vmem:[%s919_s26 + $0xe8] sm:$0xff] %vm614_vm3, %v611_v23 }
 0x10b PF: > { %s13_s12 = sadd.s32 1, %s833_s12  }
 0x10c   : > { %p10_p4 = scmp.ge.s32.totalorder %s13_s12, 4  }
 0x10e   :  { %12 = sbr.rel (!%p10_p4) target bundleno = 1 (0x1), region = 62 }

// kernel: ae_forward.10
= control target key start
LH: loop header
LB: loop body
LE: loop exit
PB: predicated region body
PF: predicated region fallthrough
CT: control target
= control target key end

     0   :  { %v458_v0 = vmov 0   ;;  %vm182_vm0 = vcmask 130048   ;;  %s647_s1 = inlined_call_operand.vmem [shape: bf16[144,16], index: 1, kind: input, shape index: {}]   ;;  %s648_s0 = inlined_call_operand.vmem [shape: bf16[128,144], index: 0, kind: input, shape index: {}]   ;;  %s649_s2 = inlined_call_operand.vmem [shape: f32[1,16], index: 2, kind: input, shape index: {}]   ;;  %s650_s3 = inlined_call_operand.vmem [shape: f32[128,16], index: 3, kind: output, shape index: {}]  }
   0x1   :  { %207 = vmatprep.subr.bf16.mxu0 %v458_v0  ;;  %406 = vmatprep.subr.bf16.mxu1 %v458_v0  ;;  %v425_v1 = vld [vmem:[%s647_s1] sm:$0xff]   ;;  %v426_v2 = vld [vmem:[%s647_s1 + $0x8] sm:$0xff]   ;;  %v427_v3 = vld [vmem:[%s647_s1 + $0x10] sm:$0xff]  }
   0x2   :  { %208 = vmatpush1.bf16.msra.mxu0 %v425_v1  ;;  %415 = vmatpush1.bf16.msra.mxu1 %v425_v1  ;;  %v428_v4 = vld [vmem:[%s647_s1 + $0x18] sm:$0xff]   ;;  %v436_v5 = vld [vmem:[%s648_s0 + $0x4] ss:$8 sps:$4 sm:$0xff]   ;;  %v431_v9 = vld [vmem:[%s647_s1 + $0x30] sm:$0xff]  }
   0x3   :  { %209 = vmatprep.subr.bf16.mxu0 %v458_v0  ;;  %407 = vmatprep.subr.bf16.mxu1 %v458_v0  ;;  %v439_v6 = vld [vmem:[%s648_s0 + $0x44] ss:$8 sps:$4 sm:$0xff]   ;;  %v432_v10 = vld [vmem:[%s647_s1 + $0x38] sm:$0xff]   ;;  %v434_v12 = vld [vmem:[%s648_s0] ss:$8 sps:$4 sm:$0xff]  }
   0x4   :  { %398 = vmatprep.mubr.msk.bf16.mxu0 %vm182_vm0, %v436_v5  ;;  %402 = vmatprep.mubr.msk.bf16.mxu1 %vm182_vm0, %v439_v6  ;;  %v429_v7 = vld [vmem:[%s647_s1 + $0x20] sm:$0xff]   ;;  %v430_v8 = vld [vmem:[%s647_s1 + $0x28] sm:$0xff]   ;;  %v440_v14 = vld [vmem:[%s648_s0 + $0x14] ss:$8 sps:$4 sm:$0xff]  }
   0x5   :  { %v433_v11 = vld [vmem:[%s647_s1 + $0x40] sm:$0xff]   ;;  %v442_v15 = vld [vmem:[%s648_s0 + $0x54] ss:$8 sps:$4 sm:$0xff]   ;;  %v444_v16 = vld [vmem:[%s648_s0 + $0x10] ss:$8 sps:$4 sm:$0xff]  }
   0x6   :  { %210 = vmatpush1.bf16.msra.mxu0 %v426_v2  ;;  %416 = vmatpush1.bf16.msra.mxu1 %v426_v2  ;;  %v437_v13 = vld [vmem:[%s648_s0 + $0x40] ss:$8 sps:$4 sm:$0xff]   ;;  %v445_v17 = vld [vmem:[%s648_s0 + $0x50] ss:$8 sps:$4 sm:$0xff]   ;;  %v446_v18 = vld [vmem:[%s648_s0 + $0x24] ss:$8 sps:$4 sm:$0xff]  }
   0x7   :  { %211 = vmatprep.subr.bf16.mxu0 %v458_v0  ;;  %408 = vmatprep.subr.bf16.mxu1 %v458_v0  ;;  %v448_v19 = vld [vmem:[%s648_s0 + $0x64] ss:$8 sps:$4 sm:$0xff]   ;;  %v450_v20 = vld [vmem:[%s648_s0 + $0x20] ss:$8 sps:$4 sm:$0xff]   ;;  %v452_v22 = vld [vmem:[%s648_s0 + $0x34] ss:$8 sps:$4 sm:$0xff]  }
   0x8   :  { %v451_v21 = vld [vmem:[%s648_s0 + $0x60] ss:$8 sps:$4 sm:$0xff]   ;;  %v454_v23 = vld [vmem:[%s648_s0 + $0x74] ss:$8 sps:$4 sm:$0xff]   ;;  %v456_v24 = vld [vmem:[%s648_s0 + $0x30] ss:$8 sps:$4 sm:$0xff]  }
   0x9   :  { %v457_v25 = vld [vmem:[%s648_s0 + $0x70] ss:$8 sps:$4 sm:$0xff]   ;;  %v565_v26 = vld [vmem:[%s649_s2] ss:$0 sm:$0xff] }
   0xa   :  { %212 = vmatpush1.bf16.msra.mxu0 %v427_v3  ;;  %417 = vmatpush1.bf16.msra.mxu1 %v427_v3 }
   0xb   :  { %213 = vmatprep.subr.bf16.mxu0 %v458_v0  ;;  %409 = vmatprep.subr.bf16.mxu1 %v458_v0 }
   0xe   :  { %214 = vmatpush1.bf16.msra.mxu0 %v428_v4  ;;  %418 = vmatpush1.bf16.msra.mxu1 %v428_v4 }
   0xf   :  { %215 = vmatprep.subr.bf16.mxu0 %v458_v0  ;;  %410 = vmatprep.subr.bf16.mxu1 %v458_v0 }
  0x12   :  { %216 = vmatpush1.bf16.msra.mxu0 %v429_v7  ;;  %419 = vmatpush1.bf16.msra.mxu1 %v429_v7 }
  0x13   :  { %217 = vmatprep.subr.bf16.mxu0 %v458_v0  ;;  %411 = vmatprep.subr.bf16.mxu1 %v458_v0 }
  0x16   :  { %218 = vmatpush1.bf16.msra.mxu0 %v430_v8  ;;  %420 = vmatpush1.bf16.msra.mxu1 %v430_v8 }
  0x17   :  { %219 = vmatprep.subr.bf16.mxu0 %v458_v0  ;;  %412 = vmatprep.subr.bf16.mxu1 %v458_v0 }
  0x1a   :  { %220 = vmatpush1.bf16.msra.mxu0 %v431_v9  ;;  %421 = vmatpush1.bf16.msra.mxu1 %v431_v9 }
  0x1b   :  { %221 = vmatprep.subr.bf16.mxu0 %v458_v0  ;;  %413 = vmatprep.subr.bf16.mxu1 %v458_v0 }
  0x1e   :  { %222 = vmatpush1.bf16.msra.mxu0 %v432_v10  ;;  %422 = vmatpush1.bf16.msra.mxu1 %v432_v10 }
  0x1f   :  { %223 = vmatprep.subr.bf16.mxu0 %v458_v0  ;;  %414 = vmatprep.subr.bf16.mxu1 %v458_v0 }
  0x22   :  { %224 = vmatpush1.bf16.msra.mxu0 %v433_v11  ;;  %423 = vmatpush1.bf16.msra.mxu1 %v433_v11 }
  0x25   :  { %240 = vmatmul.mubr.bf16.vlgmr.msra.gmra.mrb[0].mxu0 %v434_v12  ;;  %272 = vmatmul.mubr.bf16.vlgmr.msra.gmra.mrb[0].mxu1 %v437_v13 }
  0x26   :  { %399 = vmatprep.mubr.msk.bf16.mxu0 %vm182_vm0, %v440_v14  ;;  %403 = vmatprep.mubr.msk.bf16.mxu1 %vm182_vm0, %v442_v15 }
  0x2d   :  { %248 = vmatmul.mubr.bf16.gmra.mrb[4].mxu0 %v444_v16  ;;  %280 = vmatmul.mubr.bf16.gmra.mrb[4].mxu1 %v445_v17 }
  0x2e   :  { %400 = vmatprep.mubr.msk.bf16.mxu0 %vm182_vm0, %v446_v18  ;;  %404 = vmatprep.mubr.msk.bf16.mxu1 %vm182_vm0, %v448_v19 }
  0x35   :  { %256 = vmatmul.mubr.bf16.gmra.mrb[8].mxu0 %v450_v20  ;;  %288 = vmatmul.mubr.bf16.gmra.mrb[8].mxu1 %v451_v21 }
  0x36   :  { %401 = vmatprep.mubr.msk.bf16.mxu0 %vm182_vm0, %v452_v22  ;;  %405 = vmatprep.mubr.msk.bf16.mxu1 %vm182_vm0, %v454_v23 }
  0x3d   :  { %264 = vmatmul.mubr.bf16.gmra.mrb[12].mxu0 %v456_v24  ;;  %296 = vmatmul.mubr.bf16.gmra.mrb[12].mxu1 %v457_v25 }
  0xf8   :  { %v241_v27 = vpop.f32.mrb[0].mxu0  ;;  %v273_v28 = vpop.f32.mrb[0].mxu1 }
  0xf9   :  { %v242_v29 = vadd.f32 %v565_v26, %v241_v27  ;;  %v274_v30 = vadd.f32 %v565_v26, %v273_v28  ;;  %v243_v31 = vpop.f32.mrb[1].mxu0  ;;  %v275_v32 = vpop.f32.mrb[1].mxu1 }
  0xfa   :  { %v244_v33 = vpop.f32.mrb[2].mxu0  ;;  %v276_v34 = vpop.f32.mrb[2].mxu1 }
  0xfb   :  { %vm304_vm1 = vcmp.ge.f32.partialorder %v242_v29, 0.0  ;;  %v320_v35 = vmul.f32 0.01, %v242_v29  ;;  %vm312_vm2 = vcmp.ge.f32.partialorder %v274_v30, 0.0  ;;  %v328_v36 = vmul.f32 0.01, %v274_v30 }
  0xfc   :  { %v245_v37 = vadd.f32 %v565_v26, %v244_v33  ;;  %v277_v38 = vadd.f32 %v565_v26, %v276_v34  ;;  %v246_v39 = vpop.f32.mrb[3].mxu0  ;;  %v278_v40 = vpop.f32.mrb[3].mxu1 }
  0xfd   :  { %v336_v41 = vsel %vm304_vm1, %v242_v29, %v320_v35  ;;  %v344_v42 = vsel %vm312_vm2, %v274_v30, %v328_v36 }
  0xfe   :  { %352 = vst.msk [vmem:[%s650_s3] sm:$0xff] %vm182_vm0, %v336_v41  ;;  %360 = vst.msk [vmem:[%s650_s3 + $0x40] sm:$0xff] %vm182_vm0, %v344_v42  ;;  %vm305_vm3 = vcmp.ge.f32.partialorder %v245_v37, 0.0  ;;  %v321_v43 = vmul.f32 0.01, %v245_v37  ;;  %vm313_vm4 = vcmp.ge.f32.partialorder %v277_v38, 0.0 }
  0xff   :  { %v329_v44 = vmul.f32 0.01, %v277_v38 }
 0x100   :  { %v337_v45 = vsel %vm305_vm3, %v245_v37, %v321_v43  ;;  %v249_v47 = vpop.f32.mrb[4].mxu0  ;;  %v281_v48 = vpop.f32.mrb[4].mxu1 }
 0x101   :  { %v345_v46 = vsel %vm313_vm4, %v277_v38, %v329_v44  ;;  %353 = vst.msk [vmem:[%s650_s3 + $0x8] sm:$0xff] %vm182_vm0, %v337_v45  ;;  %v250_v49 = vadd.f32 %v565_v26, %v249_v47  ;;  %v282_v50 = vadd.f32 %v565_v26, %v281_v48  ;;  %v251_v51 = vpop.f32.mrb[5].mxu0  ;;  %v283_v52 = vpop.f32.mrb[5].mxu1 }
 0x102   :  { %361 = vst.msk [vmem:[%s650_s3 + $0x48] sm:$0xff] %vm182_vm0, %v345_v46  ;;  %v252_v53 = vpop.f32.mrb[6].mxu0  ;;  %v284_v54 = vpop.f32.mrb[6].mxu1 }
 0x103   :  { %vm306_vm5 = vcmp.ge.f32.partialorder %v250_v49, 0.0  ;;  %v322_v55 = vmul.f32 0.01, %v250_v49  ;;  %vm314_vm6 = vcmp.ge.f32.partialorder %v282_v50, 0.0  ;;  %v330_v56 = vmul.f32 0.01, %v282_v50 }
 0x104   :  { %v253_v57 = vadd.f32 %v565_v26, %v252_v53  ;;  %v285_v58 = vadd.f32 %v565_v26, %v284_v54  ;;  %v254_v59 = vpop.f32.mrb[7].mxu0  ;;  %v286_v60 = vpop.f32.mrb[7].mxu1 }
 0x105   :  { %v338_v61 = vsel %vm306_vm5, %v250_v49, %v322_v55  ;;  %v346_v62 = vsel %vm314_vm6, %v282_v50, %v330_v56 }
 0x106   :  { %354 = vst.msk [vmem:[%s650_s3 + $0x10] sm:$0xff] %vm182_vm0, %v338_v61  ;;  %362 = vst.msk [vmem:[%s650_s3 + $0x50] sm:$0xff] %vm182_vm0, %v346_v62  ;;  %vm307_vm7 = vcmp.ge.f32.partialorder %v253_v57, 0.0  ;;  %v323_v63 = vmul.f32 0.01, %v253_v57  ;;  %vm315_vm8 = vcmp.ge.f32.partialorder %v285_v58, 0.0 }
 0x107   :  { %v331_v0 = vmul.f32 0.01, %v285_v58 }
 0x108   :  { %v339_v1 = vsel %vm307_vm7, %v253_v57, %v323_v63  ;;  %v257_v3 = vpop.f32.mrb[8].mxu0  ;;  %v289_v4 = vpop.f32.mrb[8].mxu1 }
 0x109   :  { %v347_v2 = vsel %vm315_vm8, %v285_v58, %v331_v0  ;;  %355 = vst.msk [vmem:[%s650_s3 + $0x18] sm:$0xff] %vm182_vm0, %v339_v1  ;;  %v258_v5 = vadd.f32 %v565_v26, %v257_v3  ;;  %v290_v6 = vadd.f32 %v565_v26, %v289_v4  ;;  %v259_v7 = vpop.f32.mrb[9].mxu0  ;;  %v291_v8 = vpop.f32.mrb[9].mxu1 }
 0x10a   :  { %363 = vst.msk [vmem:[%s650_s3 + $0x58] sm:$0xff] %vm182_vm0, %v347_v2  ;;  %v260_v9 = vpop.f32.mrb[10].mxu0  ;;  %v292_v10 = vpop.f32.mrb[10].mxu1 }
 0x10b   :  { %vm308_vm9 = vcmp.ge.f32.partialorder %v258_v5, 0.0  ;;  %v324_v11 = vmul.f32 0.01, %v258_v5  ;;  %vm316_vm10 = vcmp.ge.f32.partialorder %v290_v6, 0.0  ;;  %v332_v12 = vmul.f32 0.01, %v290_v6 }
 0x10c   :  { %v261_v13 = vadd.f32 %v565_v26, %v260_v9  ;;  %v293_v14 = vadd.f32 %v565_v26, %v292_v10  ;;  %v262_v15 = vpop.f32.mrb[11].mxu0  ;;  %v294_v16 = vpop.f32.mrb[11].mxu1 }
 0x10d   :  { %v340_v17 = vsel %vm308_vm9, %v258_v5, %v324_v11  ;;  %v348_v18 = vsel %vm316_vm10, %v290_v6, %v332_v12 }
 0x10e   :  { %356 = vst.msk [vmem:[%s650_s3 + $0x20] sm:$0xff] %vm182_vm0, %v340_v17  ;;  %364 = vst.msk [vmem:[%s650_s3 + $0x60] sm:$0xff] %vm182_vm0, %v348_v18  ;;  %vm309_vm11 = vcmp.ge.f32.partialorder %v261_v13, 0.0  ;;  %v325_v19 = vmul.f32 0.01, %v261_v13  ;;  %vm317_vm12 = vcmp.ge.f32.partialorder %v293_v14, 0.0 }
 0x10f   :  { %v333_v20 = vmul.f32 0.01, %v293_v14 }
 0x110   :  { %v341_v21 = vsel %vm309_vm11, %v261_v13, %v325_v19  ;;  %v265_v23 = vpop.f32.mrb[12].mxu0  ;;  %v297_v24 = vpop.f32.mrb[12].mxu1 }
 0x111   :  { %v349_v22 = vsel %vm317_vm12, %v293_v14, %v333_v20  ;;  %357 = vst.msk [vmem:[%s650_s3 + $0x28] sm:$0xff] %vm182_vm0, %v341_v21  ;;  %v266_v25 = vadd.f32 %v565_v26, %v265_v23  ;;  %v298_v27 = vadd.f32 %v565_v26, %v297_v24  ;;  %v267_v28 = vpop.f32.mrb[13].mxu0  ;;  %v299_v29 = vpop.f32.mrb[13].mxu1 }
 0x112   :  { %365 = vst.msk [vmem:[%s650_s3 + $0x68] sm:$0xff] %vm182_vm0, %v349_v22  ;;  %v268_v30 = vpop.f32.mrb[14].mxu0  ;;  %v300_v31 = vpop.f32.mrb[14].mxu1 }
 0x113   :  { %vm310_vm13 = vcmp.ge.f32.partialorder %v266_v25, 0.0  ;;  %v326_v32 = vmul.f32 0.01, %v266_v25  ;;  %vm318_vm14 = vcmp.ge.f32.partialorder %v298_v27, 0.0  ;;  %v334_v33 = vmul.f32 0.01, %v298_v27 }
 0x114   :  { %v269_v34 = vadd.f32 %v565_v26, %v268_v30  ;;  %v301_v35 = vadd.f32 %v565_v26, %v300_v31  ;;  %v270_v36 = vpop.f32.mrb[15].mxu0  ;;  %v302_v37 = vpop.f32.mrb[15].mxu1 }
 0x115   :  { %v342_v38 = vsel %vm310_vm13, %v266_v25, %v326_v32  ;;  %v350_v39 = vsel %vm318_vm14, %v298_v27, %v334_v33 }
 0x116   :  { %358 = vst.msk [vmem:[%s650_s3 + $0x30] sm:$0xff] %vm182_vm0, %v342_v38  ;;  %366 = vst.msk [vmem:[%s650_s3 + $0x70] sm:$0xff] %vm182_vm0, %v350_v39  ;;  %vm311_vm15 = vcmp.ge.f32.partialorder %v269_v34, 0.0  ;;  %v327_v40 = vmul.f32 0.01, %v269_v34  ;;  %vm319_vm1 = vcmp.ge.f32.partialorder %v301_v35, 0.0 }
 0x117   :  { %v335_v41 = vmul.f32 0.01, %v301_v35 }
 0x118   :  { %v343_v42 = vsel %vm311_vm15, %v269_v34, %v327_v40 }
 0x119   :  { %v351_v26 = vsel %vm319_vm1, %v301_v35, %v335_v41  ;;  %359 = vst.msk [vmem:[%s650_s3 + $0x38] sm:$0xff] %vm182_vm0, %v343_v42 }
 0x11a   :  { %367 = vst.msk [vmem:[%s650_s3 + $0x78] sm:$0xff] %vm182_vm0, %v351_v26 }

// kernel: ae_forward.11
= control target key start
LH: loop header
LB: loop body
LE: loop exit
PB: predicated region body
PF: predicated region fallthrough
CT: control target
= control target key end

     0   :  { %v242_v0 = vmov 0   ;;  %vm116_vm0 = vcmask 130048   ;;  %s323_s1 = inlined_call_operand.vmem [shape: bf16[144,16], index: 1, kind: input, shape index: {}]   ;;  %s324_s0 = inlined_call_operand.vmem [shape: bf16[32,144], index: 0, kind: input, shape index: {}]   ;;  %s325_s2 = inlined_call_operand.vmem [shape: f32[1,16], index: 2, kind: input, shape index: {}]   ;;  %s326_s3 = inlined_call_operand.vmem [shape: f32[32,16], index: 3, kind: output, shape index: {}]  }
   0x1   :  { %123 = vmatprep.subr.bf16.mxu0 %v242_v0  ;;  %208 = vmatprep.subr.bf16.mxu1 %v242_v0  ;;  %v227_v1 = vld [vmem:[%s323_s1] sm:$0xff]   ;;  %v228_v2 = vld [vmem:[%s323_s1 + $0x8] sm:$0xff]   ;;  %v229_v3 = vld [vmem:[%s323_s1 + $0x10] sm:$0xff]  }
   0x2   :  { %124 = vmatpush1.bf16.msra.mxu0 %v227_v1  ;;  %217 = vmatpush1.bf16.msra.mxu1 %v227_v1  ;;  %v230_v4 = vld [vmem:[%s323_s1 + $0x18] sm:$0xff]   ;;  %v238_v5 = vld [vmem:[%s324_s0 + $0x4] ss:$8 sps:$4 sm:$0xff]   ;;  %v233_v9 = vld [vmem:[%s323_s1 + $0x30] sm:$0xff]  }
   0x3   :  { %125 = vmatprep.subr.bf16.mxu0 %v242_v0  ;;  %209 = vmatprep.subr.bf16.mxu1 %v242_v0  ;;  %v241_v6 = vld [vmem:[%s324_s0 + $0x14] ss:$8 sps:$4 sm:$0xff]   ;;  %v231_v7 = vld [vmem:[%s323_s1 + $0x20] sm:$0xff]   ;;  %v232_v8 = vld [vmem:[%s323_s1 + $0x28] sm:$0xff]  }
   0x4   :  { %206 = vmatprep.mubr.msk.bf16.mxu0 %vm116_vm0, %v238_v5  ;;  %207 = vmatprep.mubr.msk.bf16.mxu1 %vm116_vm0, %v241_v6  ;;  %v234_v10 = vld [vmem:[%s323_s1 + $0x38] sm:$0xff]   ;;  %v235_v11 = vld [vmem:[%s323_s1 + $0x40] sm:$0xff]  }
   0x5   :  { %v236_v12 = vld [vmem:[%s324_s0] ss:$8 sps:$4 sm:$0xff]   ;;  %v239_v13 = vld [vmem:[%s324_s0 + $0x10] ss:$8 sps:$4 sm:$0xff]  }
   0x6   :  { %126 = vmatpush1.bf16.msra.mxu0 %v228_v2  ;;  %218 = vmatpush1.bf16.msra.mxu1 %v228_v2  ;;  %v192_v14 = vld [vmem:[%s325_s2] ss:$0 sm:$0xff] }
   0x7   :  { %127 = vmatprep.subr.bf16.mxu0 %v242_v0  ;;  %210 = vmatprep.subr.bf16.mxu1 %v242_v0 }
   0xa   :  { %128 = vmatpush1.bf16.msra.mxu0 %v229_v3  ;;  %219 = vmatpush1.bf16.msra.mxu1 %v229_v3 }
   0xb   :  { %129 = vmatprep.subr.bf16.mxu0 %v242_v0  ;;  %211 = vmatprep.subr.bf16.mxu1 %v242_v0 }
   0xe   :  { %130 = vmatpush1.bf16.msra.mxu0 %v230_v4  ;;  %220 = vmatpush1.bf16.msra.mxu1 %v230_v4 }
   0xf   :  { %131 = vmatprep.subr.bf16.mxu0 %v242_v0  ;;  %212 = vmatprep.subr.bf16.mxu1 %v242_v0 }
  0x12   :  { %132 = vmatpush1.bf16.msra.mxu0 %v231_v7  ;;  %221 = vmatpush1.bf16.msra.mxu1 %v231_v7 }
  0x13   :  { %133 = vmatprep.subr.bf16.mxu0 %v242_v0  ;;  %213 = vmatprep.subr.bf16.mxu1 %v242_v0 }
  0x16   :  { %134 = vmatpush1.bf16.msra.mxu0 %v232_v8  ;;  %222 = vmatpush1.bf16.msra.mxu1 %v232_v8 }
  0x17   :  { %135 = vmatprep.subr.bf16.mxu0 %v242_v0  ;;  %214 = vmatprep.subr.bf16.mxu1 %v242_v0 }
  0x1a   :  { %136 = vmatpush1.bf16.msra.mxu0 %v233_v9  ;;  %223 = vmatpush1.bf16.msra.mxu1 %v233_v9 }
  0x1b   :  { %137 = vmatprep.subr.bf16.mxu0 %v242_v0  ;;  %215 = vmatprep.subr.bf16.mxu1 %v242_v0 }
  0x1e   :  { %138 = vmatpush1.bf16.msra.mxu0 %v234_v10  ;;  %224 = vmatpush1.bf16.msra.mxu1 %v234_v10 }
  0x1f   :  { %139 = vmatprep.subr.bf16.mxu0 %v242_v0  ;;  %216 = vmatprep.subr.bf16.mxu1 %v242_v0 }
  0x22   :  { %140 = vmatpush1.bf16.msra.mxu0 %v235_v11  ;;  %225 = vmatpush1.bf16.msra.mxu1 %v235_v11 }
  0x25   :  { %156 = vmatmul.mubr.bf16.vlgmr.msra.gmra.mrb[0].mxu0 %v236_v12  ;;  %164 = vmatmul.mubr.bf16.vlgmr.msra.gmra.mrb[0].mxu1 %v239_v13 }
  0xf8   :  { %v157_v15 = vpop.f32.mrb[0].mxu0  ;;  %v165_v16 = vpop.f32.mrb[0].mxu1 }
  0xf9   :  { %v158_v17 = vadd.f32 %v192_v14, %v157_v15  ;;  %v166_v18 = vadd.f32 %v192_v14, %v165_v16  ;;  %v159_v19 = vpop.f32.mrb[1].mxu0  ;;  %v167_v20 = vpop.f32.mrb[1].mxu1 }
  0xfa   :  { %v160_v21 = vpop.f32.mrb[2].mxu0  ;;  %v168_v22 = vpop.f32.mrb[2].mxu1 }
  0xfb   :  { %vm172_vm1 = vcmp.ge.f32.partialorder %v158_v17, 0.0  ;;  %v176_v23 = vmul.f32 0.01, %v158_v17  ;;  %vm174_vm2 = vcmp.ge.f32.partialorder %v166_v18, 0.0  ;;  %v178_v24 = vmul.f32 0.01, %v166_v18 }
  0xfc   :  { %v161_v25 = vadd.f32 %v192_v14, %v160_v21  ;;  %v169_v26 = vadd.f32 %v192_v14, %v168_v22  ;;  %v162_v27 = vpop.f32.mrb[3].mxu0  ;;  %v170_v28 = vpop.f32.mrb[3].mxu1 }
  0xfd   :  { %v180_v29 = vsel %vm172_vm1, %v158_v17, %v176_v23  ;;  %v182_v30 = vsel %vm174_vm2, %v166_v18, %v178_v24 }
  0xfe   :  { %184 = vst.msk [vmem:[%s326_s3] sm:$0xff] %vm116_vm0, %v180_v29  ;;  %186 = vst.msk [vmem:[%s326_s3 + $0x10] sm:$0xff] %vm116_vm0, %v182_v30  ;;  %vm173_vm3 = vcmp.ge.f32.partialorder %v161_v25, 0.0  ;;  %v177_v31 = vmul.f32 0.01, %v161_v25  ;;  %vm175_vm4 = vcmp.ge.f32.partialorder %v169_v26, 0.0 }
  0xff   :  { %v179_v32 = vmul.f32 0.01, %v169_v26 }
 0x100   :  { %v181_v33 = vsel %vm173_vm3, %v161_v25, %v177_v31 }
 0x101   :  { %v183_v34 = vsel %vm175_vm4, %v169_v26, %v179_v32  ;;  %185 = vst.msk [vmem:[%s326_s3 + $0x8] sm:$0xff] %vm116_vm0, %v181_v33 }
 0x102   :  { %187 = vst.msk [vmem:[%s326_s3 + $0x18] sm:$0xff] %vm116_vm0, %v183_v34 }

// kernel: ae_forward.12
= control target key start
LH: loop header
LB: loop body
LE: loop exit
PB: predicated region body
PF: predicated region fallthrough
CT: control target
= control target key end

     0   :  { %v178_v0 = vmov 0   ;;  %vm101_vm0 = vcmask 130048   ;;  %s237_s1 = inlined_call_operand.vmem [shape: bf16[144,16], index: 1, kind: input, shape index: {}]   ;;  %s238_s0 = inlined_call_operand.vmem [shape: bf16[8,144], index: 0, kind: input, shape index: {}]   ;;  %s239_s2 = inlined_call_operand.vmem [shape: f32[1,16], index: 2, kind: input, shape index: {}]   ;;  %s240_s3 = inlined_call_operand.vmem [shape: f32[8,16], index: 3, kind: output, shape index: {}]  }
   0x1   :  { %105 = vmatprep.subr.bf16.mxu0 %v178_v0  ;;  %v167_v1 = vld [vmem:[%s237_s1] sm:$0xff]   ;;  %v168_v2 = vld [vmem:[%s237_s1 + $0x8] sm:$0xff]   ;;  %v169_v3 = vld [vmem:[%s237_s1 + $0x10] sm:$0xff]  }
   0x2   :  { %106 = vmatpush1.bf16.msra.mxu0 %v167_v1  ;;  %v15_v4 = vld [vmem:[%s238_s0] sm:$0xff]  ;;  %v170_v5 = vld [vmem:[%s237_s1 + $0x18] sm:$0xff]   ;;  %v172_v8 = vld [vmem:[%s237_s1 + $0x28] sm:$0xff]  }
   0x3   :  { %107 = vmatprep.subr.bf16.mxu0 %v178_v0  ;;  %v155_v6 = vcombine.high %v15_v4, %v15_v4  ;;  %v171_v7 = vld [vmem:[%s237_s1 + $0x20] sm:$0xff]   ;;  %v173_v9 = vld [vmem:[%s237_s1 + $0x30] sm:$0xff]   ;;  %v174_v10 = vld [vmem:[%s237_s1 + $0x38] sm:$0xff]   ;;  %v154_v12 = vcombine.low %v15_v4, %v15_v4 }
   0x4   :  { %v175_v11 = vld [vmem:[%s237_s1 + $0x40] sm:$0xff]  }
   0x5   :  { %165 = vmatprep.mubr.msk.bf16.mxu0 %vm101_vm0, %v155_v6  ;;  %v153_v13 = vld [vmem:[%s239_s2] ss:$0 sm:$0xff] }
   0x6   :  { %108 = vmatpush1.bf16.msra.mxu0 %v168_v2 }
   0x7   :  { %109 = vmatprep.subr.bf16.mxu0 %v178_v0 }
   0xa   :  { %110 = vmatpush1.bf16.msra.mxu0 %v169_v3 }
   0xb   :  { %111 = vmatprep.subr.bf16.mxu0 %v178_v0 }
   0xe   :  { %112 = vmatpush1.bf16.msra.mxu0 %v170_v5 }
   0xf   :  { %113 = vmatprep.subr.bf16.mxu0 %v178_v0 }
  0x12   :  { %114 = vmatpush1.bf16.msra.mxu0 %v171_v7 }
  0x13   :  { %115 = vmatprep.subr.bf16.mxu0 %v178_v0 }
  0x16   :  { %116 = vmatpush1.bf16.msra.mxu0 %v172_v8 }
  0x17   :  { %117 = vmatprep.subr.bf16.mxu0 %v178_v0 }
  0x1a   :  { %118 = vmatpush1.bf16.msra.mxu0 %v173_v9 }
  0x1b   :  { %119 = vmatprep.subr.bf16.mxu0 %v178_v0 }
  0x1e   :  { %120 = vmatpush1.bf16.msra.mxu0 %v174_v10 }
  0x1f   :  { %121 = vmatprep.subr.bf16.mxu0 %v178_v0 }
  0x22   :  { %122 = vmatpush1.bf16.msra.mxu0 %v175_v11 }
  0x25   :  { %138 = vmatmul.mubr.bf16.vlgmr.msra.gmra.mrb[0].mxu0 %v154_v12 }
  0xf8   :  { %v139_v14 = vpop.f32.mrb[0].mxu0 }
  0xf9   :  { %v140_v15 = vadd.f32 %v153_v13, %v139_v14  ;;  %v141_v16 = vpop.f32.mrb[1].mxu0 }
  0xfa   :  { %v142_v17 = vpop.f32.mrb[2].mxu0 }
  0xfb   :  { %vm145_vm1 = vcmp.ge.f32.partialorder %v140_v15, 0.0  ;;  %v146_v18 = vmul.f32 0.01, %v140_v15  ;;  %v143_v19 = vpop.f32.mrb[3].mxu0 }
  0xfd   :  { %v147_v20 = vsel %vm145_vm1, %v140_v15, %v146_v18 }
  0xfe   :  { %148 = vst.msk [vmem:[%s240_s3] sm:$0xff] %vm101_vm0, %v147_v20 }

// kernel: ae_forward.16
= control target key start
LH: loop header
LB: loop body
LE: loop exit
PB: predicated region body
PF: predicated region fallthrough
CT: control target
= control target key end

     0   :  { %s1011_s12 = smov 0   ;;  %s1215_s0 = inlined_call_operand.vmem [shape: bf16[512,144], index: 0, kind: input, shape index: {}]   ;;  %s1216_s1 = inlined_call_operand.vmem [shape: bf16[144,16], index: 1, kind: input, shape index: {}]   ;;  %s1217_s2 = inlined_call_operand.vmem [shape: f32[1,16], index: 2, kind: input, shape index: {}]   ;;  %s1218_s3 = inlined_call_operand.vmem [shape: f32[512,16], index: 3, kind: output, shape index: {}]  }
   0x1 LB: > { %s827_s13 = sadd.s32 4294967295, %s988_s12   ;;  %p831_p0 = scmp.ge.s32.totalorder %s988_s12, 1  ;;  %s988_s12 = sphi %s1011_s12, %s13_s12  }
   0x2   : > { %p139_p1 = scmp.lt.s32.totalorder %s988_s12, 3 }
   0x4   : > { %p140_p2 = pnand %p831_p0, %p139_p1 }
   0x5   : > { %v925_v0 = vld [vmem:[%s1216_s1] sm:$0xff] (!%p140_p2)   ;;  %v990_v1 = vmov (!%p140_p2), 0   ;;  %s832_s16 = sshll.u32 (!%p140_p2), %s827_s13, 5  ;;  %v926_v2 = vld [vmem:[%s1216_s1 + $0x8] sm:$0xff] (!%p140_p2)   ;;  %v927_v3 = vld [vmem:[%s1216_s1 + $0x10] sm:$0xff] (!%p140_p2)   ;;  %vm433_vm0 = vcmask (!%p140_p2), 130048  }
   0x6   : > { %143 = sbr.rel (%p140_p2) target bundleno = 320 (0x140), region = 32  ;;  %482 = vmatprep.subr.bf16.mxu0 (!%p140_p2), %v990_v1  ;;  %898 = vmatprep.subr.bf16.mxu1 (!%p140_p2), %v990_v1  ;;  %p165_p3 = scmp.lt.s32.totalorder (!%p140_p2), %s832_s16, 63  ;;  %v928_v4 = vld [vmem:[%s1216_s1 + $0x18] sm:$0xff] (!%p140_p2)   ;;  %v929_v7 = vld [vmem:[%s1216_s1 + $0x20] sm:$0xff] (!%p140_p2)   ;;  %v930_v8 = vld [vmem:[%s1216_s1 + $0x28] sm:$0xff] (!%p140_p2)  }
   0x7   : > { %483 = vmatpush1.bf16.msra.mxu0 (!%p140_p2), %v925_v0  ;;  %907 = vmatpush1.bf16.msra.mxu1 (!%p140_p2), %v925_v0  ;;  %v931_v9 = vld [vmem:[%s1216_s1 + $0x30] sm:$0xff] (!%p140_p2)   ;;  %v932_v10 = vld [vmem:[%s1216_s1 + $0x38] sm:$0xff] (!%p140_p2)   ;;  %v933_v11 = vld [vmem:[%s1216_s1 + $0x40] sm:$0xff] (!%p140_p2)  }
   0x8   : > { %484 = vmatprep.subr.bf16.mxu0 (!%p140_p2), %v990_v1  ;;  %899 = vmatprep.subr.bf16.mxu1 (!%p140_p2), %v990_v1  ;;  %v1107_v42 = vld [vmem:[%s1217_s2] ss:$0 sm:$0xff] (!%p140_p2) }
   0xb   : > { %485 = vmatpush1.bf16.msra.mxu0 (!%p140_p2), %v926_v2  ;;  %908 = vmatpush1.bf16.msra.mxu1 (!%p140_p2), %v926_v2 }
   0xc   : > { %486 = vmatprep.subr.bf16.mxu0 (!%p140_p2), %v990_v1  ;;  %900 = vmatprep.subr.bf16.mxu1 (!%p140_p2), %v990_v1 }
   0xd   : > { %s1220_s16 = smov (!%p165_p3, %s832_s16), 63 }
   0xe   : > { %s897_s21 = sshll.u32 %s1220_s16, 3 }
   0xf   : > { %s1036_s24 = scalar_lea.vmem %s1215_s0, %s897_s21  ;;  %487 = vmatpush1.bf16.msra.mxu0 %v927_v3  ;;  %909 = vmatpush1.bf16.msra.mxu1 %v927_v3  ;;  %s1116_s15 = scalar_lea.vmem %s1218_s3, %s897_s21 }
  0x10   : > { %v936_v5 = vld [vmem:[%s1036_s24 + $0x4] ss:$8 sps:$4 sm:$0xff]   ;;  %488 = vmatprep.subr.bf16.mxu0 %v990_v1  ;;  %901 = vmatprep.subr.bf16.mxu1 %v990_v1  ;;  %v934_v12 = vld [vmem:[%s1036_s24] ss:$8 sps:$4 sm:$0xff]   ;;  %v940_v14 = vld [vmem:[%s1036_s24 + $0x14] ss:$8 sps:$4 sm:$0xff]  }
  0x11   : > { %v939_v6 = vld [vmem:[%s1036_s24 + $0x84] ss:$8 sps:$4 sm:$0xff]   ;;  %879 = vmatprep.mubr.msk.bf16.mxu0 %vm433_vm0, %v936_v5  ;;  %v937_v13 = vld [vmem:[%s1036_s24 + $0x80] ss:$8 sps:$4 sm:$0xff]   ;;  %v942_v15 = vld [vmem:[%s1036_s24 + $0x94] ss:$8 sps:$4 sm:$0xff]  }
  0x12   : > { %887 = vmatprep.mubr.msk.bf16.mxu1 %vm433_vm0, %v939_v6  ;;  %v944_v16 = vld [vmem:[%s1036_s24 + $0x10] ss:$8 sps:$4 sm:$0xff]   ;;  %v946_v18 = vld [vmem:[%s1036_s24 + $0x24] ss:$8 sps:$4 sm:$0xff]   ;;  %v950_v20 = vld [vmem:[%s1036_s24 + $0x20] ss:$8 sps:$4 sm:$0xff]  }
  0x13   : > { %489 = vmatpush1.bf16.msra.mxu0 %v928_v4  ;;  %910 = vmatpush1.bf16.msra.mxu1 %v928_v4  ;;  %v945_v17 = vld [vmem:[%s1036_s24 + $0x90] ss:$8 sps:$4 sm:$0xff]   ;;  %v948_v19 = vld [vmem:[%s1036_s24 + $0xa4] ss:$8 sps:$4 sm:$0xff]   ;;  %v951_v21 = vld [vmem:[%s1036_s24 + $0xa0] ss:$8 sps:$4 sm:$0xff]  }
  0x14   : > { %490 = vmatprep.subr.bf16.mxu0 %v990_v1  ;;  %902 = vmatprep.subr.bf16.mxu1 %v990_v1  ;;  %v952_v22 = vld [vmem:[%s1036_s24 + $0x34] ss:$8 sps:$4 sm:$0xff]   ;;  %v956_v24 = vld [vmem:[%s1036_s24 + $0x30] ss:$8 sps:$4 sm:$0xff]   ;;  %v958_v26 = vld [vmem:[%s1036_s24 + $0x44] ss:$8 sps:$4 sm:$0xff]  }
  0x15   : > { %v954_v23 = vld [vmem:[%s1036_s24 + $0xb4] ss:$8 sps:$4 sm:$0xff]   ;;  %v957_v25 = vld [vmem:[%s1036_s24 + $0xb0] ss:$8 sps:$4 sm:$0xff]   ;;  %v960_v27 = vld [vmem:[%s1036_s24 + $0xc4] ss:$8 sps:$4 sm:$0xff]  }
  0x16   : > { %v962_v28 = vld [vmem:[%s1036_s24 + $0x40] ss:$8 sps:$4 sm:$0xff]   ;;  %v964_v30 = vld [vmem:[%s1036_s24 + $0x54] ss:$8 sps:$4 sm:$0xff]   ;;  %v968_v32 = vld [vmem:[%s1036_s24 + $0x50] ss:$8 sps:$4 sm:$0xff]  }
  0x17   : > { %491 = vmatpush1.bf16.msra.mxu0 %v929_v7  ;;  %911 = vmatpush1.bf16.msra.mxu1 %v929_v7  ;;  %v963_v29 = vld [vmem:[%s1036_s24 + $0xc0] ss:$8 sps:$4 sm:$0xff]   ;;  %v966_v31 = vld [vmem:[%s1036_s24 + $0xd4] ss:$8 sps:$4 sm:$0xff]   ;;  %v969_v33 = vld [vmem:[%s1036_s24 + $0xd0] ss:$8 sps:$4 sm:$0xff]  }
  0x18   : > { %492 = vmatprep.subr.bf16.mxu0 %v990_v1  ;;  %903 = vmatprep.subr.bf16.mxu1 %v990_v1  ;;  %v970_v34 = vld [vmem:[%s1036_s24 + $0x64] ss:$8 sps:$4 sm:$0xff]   ;;  %v974_v36 = vld [vmem:[%s1036_s24 + $0x60] ss:$8 sps:$4 sm:$0xff]   ;;  %v976_v38 = vld [vmem:[%s1036_s24 + $0x74] ss:$8 sps:$4 sm:$0xff]  }
  0x19   : > { %v972_v35 = vld [vmem:[%s1036_s24 + $0xe4] ss:$8 sps:$4 sm:$0xff]   ;;  %v975_v37 = vld [vmem:[%s1036_s24 + $0xe0] ss:$8 sps:$4 sm:$0xff]   ;;  %v978_v39 = vld [vmem:[%s1036_s24 + $0xf4] ss:$8 sps:$4 sm:$0xff]  }
  0x1a   : > { %v980_v40 = vld [vmem:[%s1036_s24 + $0x70] ss:$8 sps:$4 sm:$0xff]  }
  0x1b   : > { %493 = vmatpush1.bf16.msra.mxu0 %v930_v8  ;;  %912 = vmatpush1.bf16.msra.mxu1 %v930_v8  ;;  %v981_v41 = vld [vmem:[%s1036_s24 + $0xf0] ss:$8 sps:$4 sm:$0xff]  }
  0x1c   : > { %494 = vmatprep.subr.bf16.mxu0 %v990_v1  ;;  %904 = vmatprep.subr.bf16.mxu1 %v990_v1 }
  0x1f   : > { %495 = vmatpush1.bf16.msra.mxu0 %v931_v9  ;;  %913 = vmatpush1.bf16.msra.mxu1 %v931_v9 }
  0x20   : > { %496 = vmatprep.subr.bf16.mxu0 %v990_v1  ;;  %905 = vmatprep.subr.bf16.mxu1 %v990_v1 }
  0x23   : > { %497 = vmatpush1.bf16.msra.mxu0 %v932_v10  ;;  %914 = vmatpush1.bf16.msra.mxu1 %v932_v10 }
  0x24   : > { %498 = vmatprep.subr.bf16.mxu0 %v990_v1  ;;  %906 = vmatprep.subr.bf16.mxu1 %v990_v1 }
  0x27   : > { %499 = vmatpush1.bf16.msra.mxu0 %v933_v11  ;;  %915 = vmatpush1.bf16.msra.mxu1 %v933_v11 }
  0x2a   : > { %515 = vmatmul.mubr.bf16.vlgmr.msra.gmra.mrb[0].mxu0 %v934_v12  ;;  %579 = vmatmul.mubr.bf16.vlgmr.msra.gmra.mrb[0].mxu1 %v937_v13 }
  0x2b   : > { %880 = vmatprep.mubr.msk.bf16.mxu0 %vm433_vm0, %v940_v14  ;;  %888 = vmatprep.mubr.msk.bf16.mxu1 %vm433_vm0, %v942_v15 }
  0x32   : > { %523 = vmatmul.mubr.bf16.gmra.mrb[4].mxu0 %v944_v16  ;;  %587 = vmatmul.mubr.bf16.gmra.mrb[4].mxu1 %v945_v17 }
  0x33   : > { %881 = vmatprep.mubr.msk.bf16.mxu0 %vm433_vm0, %v946_v18  ;;  %889 = vmatprep.mubr.msk.bf16.mxu1 %vm433_vm0, %v948_v19 }
  0x3a   : > { %531 = vmatmul.mubr.bf16.gmra.mrb[8].mxu0 %v950_v20  ;;  %595 = vmatmul.mubr.bf16.gmra.mrb[8].mxu1 %v951_v21 }
  0x3b   : > { %882 = vmatprep.mubr.msk.bf16.mxu0 %vm433_vm0, %v952_v22  ;;  %890 = vmatprep.mubr.msk.bf16.mxu1 %vm433_vm0, %v954_v23 }
  0x42   : > { %539 = vmatmul.mubr.bf16.gmra.mrb[12].mxu0 %v956_v24  ;;  %603 = vmatmul.mubr.bf16.gmra.mrb[12].mxu1 %v957_v25 }
  0x43   : > { %883 = vmatprep.mubr.msk.bf16.mxu0 %vm433_vm0, %v958_v26  ;;  %891 = vmatprep.mubr.msk.bf16.mxu1 %vm433_vm0, %v960_v27 }
  0x4a   : > { %547 = vmatmul.mubr.bf16.gmra.mrb[16].mxu0 %v962_v28  ;;  %611 = vmatmul.mubr.bf16.gmra.mrb[16].mxu1 %v963_v29 }
  0x4b   : > { %884 = vmatprep.mubr.msk.bf16.mxu0 %vm433_vm0, %v964_v30  ;;  %892 = vmatprep.mubr.msk.bf16.mxu1 %vm433_vm0, %v966_v31 }
  0x52   : > { %555 = vmatmul.mubr.bf16.gmra.mrb[20].mxu0 %v968_v32  ;;  %619 = vmatmul.mubr.bf16.gmra.mrb[20].mxu1 %v969_v33 }
  0x53   : > { %885 = vmatprep.mubr.msk.bf16.mxu0 %vm433_vm0, %v970_v34  ;;  %893 = vmatprep.mubr.msk.bf16.mxu1 %vm433_vm0, %v972_v35 }
  0x5a   : > { %563 = vmatmul.mubr.bf16.gmra.mrb[24].mxu0 %v974_v36  ;;  %627 = vmatmul.mubr.bf16.gmra.mrb[24].mxu1 %v975_v37 }
  0x5b   : > { %886 = vmatprep.mubr.msk.bf16.mxu0 %vm433_vm0, %v976_v38  ;;  %894 = vmatprep.mubr.msk.bf16.mxu1 %vm433_vm0, %v978_v39 }
  0x62   : > { %571 = vmatmul.mubr.bf16.gmra.mrb[28].mxu0 %v980_v40  ;;  %635 = vmatmul.mubr.bf16.gmra.mrb[28].mxu1 %v981_v41 }
  0xfd   : > { %v516_v43 = vpop.f32.mrb[0].mxu0  ;;  %v580_v44 = vpop.f32.mrb[0].mxu1 }
  0xfe   : > { %v517_v45 = vadd.f32 %v1107_v42, %v516_v43  ;;  %v581_v46 = vadd.f32 %v1107_v42, %v580_v44  ;;  %v518_v47 = vpop.f32.mrb[1].mxu0  ;;  %v582_v48 = vpop.f32.mrb[1].mxu1 }
  0xff   : > { %v519_v49 = vpop.f32.mrb[2].mxu0  ;;  %v583_v50 = vpop.f32.mrb[2].mxu1 }
 0x100   : > { %vm643_vm1 = vcmp.ge.f32.partialorder %v517_v45, 0.0  ;;  %v675_v51 = vmul.f32 0.01, %v517_v45  ;;  %vm659_vm2 = vcmp.ge.f32.partialorder %v581_v46, 0.0  ;;  %v691_v52 = vmul.f32 0.01, %v581_v46 }
 0x101   : > { %v520_v53 = vadd.f32 %v1107_v42, %v519_v49  ;;  %v584_v54 = vadd.f32 %v1107_v42, %v583_v50  ;;  %v521_v55 = vpop.f32.mrb[3].mxu0  ;;  %v585_v56 = vpop.f32.mrb[3].mxu1 }
 0x102   : > { %v707_v57 = vsel %vm643_vm1, %v517_v45, %v675_v51  ;;  %v723_v58 = vsel %vm659_vm2, %v581_v46, %v691_v52 }
 0x103   : > { %739 = vst.msk [vmem:[%s1116_s15] sm:$0xff] %vm433_vm0, %v707_v57  ;;  %755 = vst.msk [vmem:[%s1116_s15 + $0x80] sm:$0xff] %vm433_vm0, %v723_v58  ;;  %vm644_vm3 = vcmp.ge.f32.partialorder %v520_v53, 0.0  ;;  %v676_v59 = vmul.f32 0.01, %v520_v53  ;;  %vm660_vm4 = vcmp.ge.f32.partialorder %v584_v54, 0.0 }
 0x104   : > { %v692_v60 = vmul.f32 0.01, %v584_v54 }
 0x105   : > { %v708_v61 = vsel %vm644_vm3, %v520_v53, %v676_v59  ;;  %v524_v63 = vpop.f32.mrb[4].mxu0  ;;  %v588_v0 = vpop.f32.mrb[4].mxu1 }
 0x106   : > { %v724_v62 = vsel %vm660_vm4, %v584_v54, %v692_v60  ;;  %740 = vst.msk [vmem:[%s1116_s15 + $0x8] sm:$0xff] %vm433_vm0, %v708_v61  ;;  %v525_v1 = vadd.f32 %v1107_v42, %v524_v63  ;;  %v589_v2 = vadd.f32 %v1107_v42, %v588_v0  ;;  %v526_v3 = vpop.f32.mrb[5].mxu0  ;;  %v590_v4 = vpop.f32.mrb[5].mxu1 }
 0x107   : > { %756 = vst.msk [vmem:[%s1116_s15 + $0x88] sm:$0xff] %vm433_vm0, %v724_v62  ;;  %v527_v5 = vpop.f32.mrb[6].mxu0  ;;  %v591_v6 = vpop.f32.mrb[6].mxu1 }
 0x108   : > { %vm645_vm5 = vcmp.ge.f32.partialorder %v525_v1, 0.0  ;;  %v677_v7 = vmul.f32 0.01, %v525_v1  ;;  %vm661_vm6 = vcmp.ge.f32.partialorder %v589_v2, 0.0  ;;  %v693_v8 = vmul.f32 0.01, %v589_v2 }
 0x109   : > { %v528_v9 = vadd.f32 %v1107_v42, %v527_v5  ;;  %v592_v10 = vadd.f32 %v1107_v42, %v591_v6  ;;  %v529_v11 = vpop.f32.mrb[7].mxu0  ;;  %v593_v12 = vpop.f32.mrb[7].mxu1 }
 0x10a   : > { %v709_v13 = vsel %vm645_vm5, %v525_v1, %v677_v7  ;;  %v725_v14 = vsel %vm661_vm6, %v589_v2, %v693_v8 }
 0x10b   : > { %741 = vst.msk [vmem:[%s1116_s15 + $0x10] sm:$0xff] %vm433_vm0, %v709_v13  ;;  %757 = vst.msk [vmem:[%s1116_s15 + $0x90] sm:$0xff] %vm433_vm0, %v725_v14  ;;  %vm646_vm7 = vcmp.ge.f32.partialorder %v528_v9, 0.0  ;;  %v678_v15 = vmul.f32 0.01, %v528_v9  ;;  %vm662_vm8 = vcmp.ge.f32.partialorder %v592_v10, 0.0 }
 0x10c   : > { %v694_v16 = vmul.f32 0.01, %v592_v10 }
 0x10d   : > { %v710_v17 = vsel %vm646_vm7, %v528_v9, %v678_v15  ;;  %v532_v19 = vpop.f32.mrb[8].mxu0  ;;  %v596_v20 = vpop.f32.mrb[8].mxu1 }
 0x10e   : > { %v726_v18 = vsel %vm662_vm8, %v592_v10, %v694_v16  ;;  %742 = vst.msk [vmem:[%s1116_s15 + $0x18] sm:$0xff] %vm433_vm0, %v710_v17  ;;  %v533_v21 = vadd.f32 %v1107_v42, %v532_v19  ;;  %v597_v22 = vadd.f32 %v1107_v42, %v596_v20  ;;  %v534_v23 = vpop.f32.mrb[9].mxu0  ;;  %v598_v24 = vpop.f32.mrb[9].mxu1 }
 0x10f   : > { %758 = vst.msk [vmem:[%s1116_s15 + $0x98] sm:$0xff] %vm433_vm0, %v726_v18  ;;  %v535_v25 = vpop.f32.mrb[10].mxu0  ;;  %v599_v26 = vpop.f32.mrb[10].mxu1 }
 0x110   : > { %vm647_vm9 = vcmp.ge.f32.partialorder %v533_v21, 0.0  ;;  %v679_v27 = vmul.f32 0.01, %v533_v21  ;;  %vm663_vm10 = vcmp.ge.f32.partialorder %v597_v22, 0.0  ;;  %v695_v28 = vmul.f32 0.01, %v597_v22 }
 0x111   : > { %v536_v29 = vadd.f32 %v1107_v42, %v535_v25  ;;  %v600_v30 = vadd.f32 %v1107_v42, %v599_v26  ;;  %v537_v31 = vpop.f32.mrb[11].mxu0  ;;  %v601_v32 = vpop.f32.mrb[11].mxu1 }
 0x112   : > { %v711_v33 = vsel %vm647_vm9, %v533_v21, %v679_v27  ;;  %v727_v34 = vsel %vm663_vm10, %v597_v22, %v695_v28 }
 0x113   : > { %743 = vst.msk [vmem:[%s1116_s15 + $0x20] sm:$0xff] %vm433_vm0, %v711_v33  ;;  %759 = vst.msk [vmem:[%s1116_s15 + $0xa0] sm:$0xff] %vm433_vm0, %v727_v34  ;;  %vm648_vm11 = vcmp.ge.f32.partialorder %v536_v29, 0.0  ;;  %v680_v35 = vmul.f32 0.01, %v536_v29  ;;  %vm664_vm12 = vcmp.ge.f32.partialorder %v600_v30, 0.0 }
 0x114   : > { %v696_v36 = vmul.f32 0.01, %v600_v30 }
 0x115   : > { %v712_v37 = vsel %vm648_vm11, %v536_v29, %v680_v35  ;;  %v540_v39 = vpop.f32.mrb[12].mxu0  ;;  %v604_v40 = vpop.f32.mrb[12].mxu1 }
 0x116   : > { %v728_v38 = vsel %vm664_vm12, %v600_v30, %v696_v36  ;;  %744 = vst.msk [vmem:[%s1116_s15 + $0x28] sm:$0xff] %vm433_vm0, %v712_v37  ;;  %v541_v41 = vadd.f32 %v1107_v42, %v540_v39  ;;  %v605_v43 = vadd.f32 %v1107_v42, %v604_v40  ;;  %v542_v44 = vpop.f32.mrb[13].mxu0  ;;  %v606_v45 = vpop.f32.mrb[13].mxu1 }
 0x117   : > { %760 = vst.msk [vmem:[%s1116_s15 + $0xa8] sm:$0xff] %vm433_vm0, %v728_v38  ;;  %v543_v46 = vpop.f32.mrb[14].mxu0  ;;  %v607_v47 = vpop.f32.mrb[14].mxu1 }
 0x118   : > { %vm649_vm13 = vcmp.ge.f32.partialorder %v541_v41, 0.0  ;;  %v681_v48 = vmul.f32 0.01, %v541_v41  ;;  %vm665_vm14 = vcmp.ge.f32.partialorder %v605_v43, 0.0  ;;  %v697_v49 = vmul.f32 0.01, %v605_v43 }
 0x119   : > { %v544_v50 = vadd.f32 %v1107_v42, %v543_v46  ;;  %v608_v51 = vadd.f32 %v1107_v42, %v607_v47  ;;  %v545_v52 = vpop.f32.mrb[15].mxu0  ;;  %v609_v53 = vpop.f32.mrb[15].mxu1 }
 0x11a   : > { %v713_v54 = vsel %vm649_vm13, %v541_v41, %v681_v48  ;;  %v729_v55 = vsel %vm665_vm14, %v605_v43, %v697_v49 }
 0x11b   : > { %745 = vst.msk [vmem:[%s1116_s15 + $0x30] sm:$0xff] %vm433_vm0, %v713_v54  ;;  %761 = vst.msk [vmem:[%s1116_s15 + $0xb0] sm:$0xff] %vm433_vm0, %v729_v55  ;;  %vm650_vm15 = vcmp.ge.f32.partialorder %v544_v50, 0.0  ;;  %v682_v56 = vmul.f32 0.01, %v544_v50  ;;  %vm666_vm1 = vcmp.ge.f32.partialorder %v608_v51, 0.0 }
 0x11c   : > { %v698_v57 = vmul.f32 0.01, %v608_v51 }
 0x11d   : > { %v714_v58 = vsel %vm650_vm15, %v544_v50, %v682_v56  ;;  %v548_v60 = vpop.f32.mrb[16].mxu0  ;;  %v612_v61 = vpop.f32.mrb[16].mxu1 }
 0x11e   : > { %v730_v59 = vsel %vm666_vm1, %v608_v51, %v698_v57  ;;  %746 = vst.msk [vmem:[%s1116_s15 + $0x38] sm:$0xff] %vm433_vm0, %v714_v58  ;;  %v549_v62 = vadd.f32 %v1107_v42, %v548_v60  ;;  %v613_v63 = vadd.f32 %v1107_v42, %v612_v61  ;;  %v550_v0 = vpop.f32.mrb[17].mxu0  ;;  %v614_v1 = vpop.f32.mrb[17].mxu1 }
 0x11f   : > { %762 = vst.msk [vmem:[%s1116_s15 + $0xb8] sm:$0xff] %vm433_vm0, %v730_v59  ;;  %v551_v2 = vpop.f32.mrb[18].mxu0  ;;  %v615_v3 = vpop.f32.mrb[18].mxu1 }
 0x120   : > { %vm651_vm2 = vcmp.ge.f32.partialorder %v549_v62, 0.0  ;;  %v683_v4 = vmul.f32 0.01, %v549_v62  ;;  %vm667_vm3 = vcmp.ge.f32.partialorder %v613_v63, 0.0  ;;  %v699_v5 = vmul.f32 0.01, %v613_v63 }
 0x121   : > { %v552_v6 = vadd.f32 %v1107_v42, %v551_v2  ;;  %v616_v7 = vadd.f32 %v1107_v42, %v615_v3  ;;  %v553_v8 = vpop.f32.mrb[19].mxu0  ;;  %v617_v9 = vpop.f32.mrb[19].mxu1 }
 0x122   : > { %v715_v10 = vsel %vm651_vm2, %v549_v62, %v683_v4  ;;  %v731_v11 = vsel %vm667_vm3, %v613_v63, %v699_v5 }
 0x123   : > { %747 = vst.msk [vmem:[%s1116_s15 + $0x40] sm:$0xff] %vm433_vm0, %v715_v10  ;;  %763 = vst.msk [vmem:[%s1116_s15 + $0xc0] sm:$0xff] %vm433_vm0, %v731_v11  ;;  %vm652_vm4 = vcmp.ge.f32.partialorder %v552_v6, 0.0  ;;  %v684_v12 = vmul.f32 0.01, %v552_v6  ;;  %vm668_vm5 = vcmp.ge.f32.partialorder %v616_v7, 0.0 }
 0x124   : > { %v700_v13 = vmul.f32 0.01, %v616_v7 }
 0x125   : > { %v716_v14 = vsel %vm652_vm4, %v552_v6, %v684_v12  ;;  %v556_v16 = vpop.f32.mrb[20].mxu0  ;;  %v620_v17 = vpop.f32.mrb[20].mxu1 }
 0x126   : > { %v732_v15 = vsel %vm668_vm5, %v616_v7, %v700_v13  ;;  %748 = vst.msk [vmem:[%s1116_s15 + $0x48] sm:$0xff] %vm433_vm0, %v716_v14  ;;  %v557_v18 = vadd.f32 %v1107_v42, %v556_v16  ;;  %v621_v19 = vadd.f32 %v1107_v42, %v620_v17  ;;  %v558_v20 = vpop.f32.mrb[21].mxu0  ;;  %v622_v21 = vpop.f32.mrb[21].mxu1 }
 0x127   : > { %764 = vst.msk [vmem:[%s1116_s15 + $0xc8] sm:$0xff] %vm433_vm0, %v732_v15  ;;  %v559_v22 = vpop.f32.mrb[22].mxu0  ;;  %v623_v23 = vpop.f32.mrb[22].mxu1 }
 0x128   : > { %vm653_vm6 = vcmp.ge.f32.partialorder %v557_v18, 0.0  ;;  %v685_v24 = vmul.f32 0.01, %v557_v18  ;;  %vm669_vm7 = vcmp.ge.f32.partialorder %v621_v19, 0.0  ;;  %v701_v25 = vmul.f32 0.01, %v621_v19 }
 0x129   : > { %v560_v26 = vadd.f32 %v1107_v42, %v559_v22  ;;  %v624_v27 = vadd.f32 %v1107_v42, %v623_v23  ;;  %v561_v28 = vpop.f32.mrb[23].mxu0  ;;  %v625_v29 = vpop.f32.mrb[23].mxu1 }
 0x12a   : > { %v717_v30 = vsel %vm653_vm6, %v557_v18, %v685_v24  ;;  %v733_v31 = vsel %vm669_vm7, %v621_v19, %v701_v25 }
 0x12b   : > { %749 = vst.msk [vmem:[%s1116_s15 + $0x50] sm:$0xff] %vm433_vm0, %v717_v30  ;;  %765 = vst.msk [vmem:[%s1116_s15 + $0xd0] sm:$0xff] %vm433_vm0, %v733_v31  ;;  %vm654_vm8 = vcmp.ge.f32.partialorder %v560_v26, 0.0  ;;  %v686_v32 = vmul.f32 0.01, %v560_v26  ;;  %vm670_vm9 = vcmp.ge.f32.partialorder %v624_v27, 0.0 }
 0x12c   : > { %v702_v33 = vmul.f32 0.01, %v624_v27 }
 0x12d   : > { %v718_v34 = vsel %vm654_vm8, %v560_v26, %v686_v32  ;;  %v564_v36 = vpop.f32.mrb[24].mxu0  ;;  %v628_v37 = vpop.f32.mrb[24].mxu1 }
 0x12e   : > { %v734_v35 = vsel %vm670_vm9, %v624_v27, %v702_v33  ;;  %750 = vst.msk [vmem:[%s1116_s15 + $0x58] sm:$0xff] %vm433_vm0, %v718_v34  ;;  %v565_v38 = vadd.f32 %v1107_v42, %v564_v36  ;;  %v629_v39 = vadd.f32 %v1107_v42, %v628_v37  ;;  %v566_v40 = vpop.f32.mrb[25].mxu0  ;;  %v630_v41 = vpop.f32.mrb[25].mxu1 }
 0x12f   : > { %766 = vst.msk [vmem:[%s1116_s15 + $0xd8] sm:$0xff] %vm433_vm0, %v734_v35  ;;  %v567_v43 = vpop.f32.mrb[26].mxu0  ;;  %v631_v44 = vpop.f32.mrb[26].mxu1 }
 0x130   : > { %vm655_vm10 = vcmp.ge.f32.partialorder %v565_v38, 0.0  ;;  %v687_v45 = vmul.f32 0.01, %v565_v38  ;;  %vm671_vm11 = vcmp.ge.f32.partialorder %v629_v39, 0.0  ;;  %v703_v46 = vmul.f32 0.01, %v629_v39 }
 0x131   : > { %v568_v47 = vadd.f32 %v1107_v42, %v567_v43  ;;  %v632_v48 = vadd.f32 %v1107_v42, %v631_v44  ;;  %v569_v49 = vpop.f32.mrb[27].mxu0  ;;  %v633_v50 = vpop.f32.mrb[27].mxu1 }
 0x132   : > { %v719_v51 = vsel %vm655_vm10, %v565_v38, %v687_v45  ;;  %v735_v52 = vsel %vm671_vm11, %v629_v39, %v703_v46 }
 0x133   : > { %751 = vst.msk [vmem:[%s1116_s15 + $0x60] sm:$0xff] %vm433_vm0, %v719_v51  ;;  %767 = vst.msk [vmem:[%s1116_s15 + $0xe0] sm:$0xff] %vm433_vm0, %v735_v52  ;;  %vm656_vm12 = vcmp.ge.f32.partialorder %v568_v47, 0.0  ;;  %v688_v53 = vmul.f32 0.01, %v568_v47  ;;  %vm672_vm13 = vcmp.ge.f32.partialorder %v632_v48, 0.0 }
 0x134   : > { %v704_v54 = vmul.f32 0.01, %v632_v48 }
 0x135   : > { %v720_v55 = vsel %vm656_vm12, %v568_v47, %v688_v53  ;;  %v572_v57 = vpop.f32.mrb[28].mxu0  ;;  %v636_v58 = vpop.f32.mrb[28].mxu1 }
 0x136   : > { %v736_v56 = vsel %vm672_vm13, %v632_v48, %v704_v54  ;;  %752 = vst.msk [vmem:[%s1116_s15 + $0x68] sm:$0xff] %vm433_vm0, %v720_v55  ;;  %v573_v59 = vadd.f32 %v1107_v42, %v572_v57  ;;  %v637_v60 = vadd.f32 %v1107_v42, %v636_v58  ;;  %v574_v61 = vpop.f32.mrb[29].mxu0  ;;  %v638_v62 = vpop.f32.mrb[29].mxu1 }
 0x137   : > { %768 = vst.msk [vmem:[%s1116_s15 + $0xe8] sm:$0xff] %vm433_vm0, %v736_v56  ;;  %v575_v63 = vpop.f32.mrb[30].mxu0  ;;  %v639_v0 = vpop.f32.mrb[30].mxu1 }
 0x138   : > { %vm657_vm14 = vcmp.ge.f32.partialorder %v573_v59, 0.0  ;;  %v689_v1 = vmul.f32 0.01, %v573_v59  ;;  %vm673_vm15 = vcmp.ge.f32.partialorder %v637_v60, 0.0  ;;  %v705_v2 = vmul.f32 0.01, %v637_v60 }
 0x139   : > { %v576_v3 = vadd.f32 %v1107_v42, %v575_v63  ;;  %v640_v4 = vadd.f32 %v1107_v42, %v639_v0  ;;  %v577_v5 = vpop.f32.mrb[31].mxu0  ;;  %v641_v6 = vpop.f32.mrb[31].mxu1 }
 0x13a   : > { %v721_v7 = vsel %vm657_vm14, %v573_v59, %v689_v1  ;;  %v737_v8 = vsel %vm673_vm15, %v637_v60, %v705_v2 }
 0x13b   : > { %753 = vst.msk [vmem:[%s1116_s15 + $0x70] sm:$0xff] %vm433_vm0, %v721_v7  ;;  %769 = vst.msk [vmem:[%s1116_s15 + $0xf0] sm:$0xff] %vm433_vm0, %v737_v8  ;;  %vm658_vm1 = vcmp.ge.f32.partialorder %v576_v3, 0.0  ;;  %v690_v9 = vmul.f32 0.01, %v576_v3  ;;  %vm674_vm2 = vcmp.ge.f32.partialorder %v640_v4, 0.0 }
 0x13c   : > { %v706_v10 = vmul.f32 0.01, %v640_v4 }
 0x13d   : > { %v722_v11 = vsel %vm658_vm1, %v576_v3, %v690_v9 }
 0x13e   : > { %v738_v12 = vsel %vm674_vm2, %v640_v4, %v706_v10  ;;  %754 = vst.msk [vmem:[%s1116_s15 + $0x78] sm:$0xff] %vm433_vm0, %v722_v11 }
 0x13f   : > { %770 = vst.msk [vmem:[%s1116_s15 + $0xf8] sm:$0xff] %vm433_vm0, %v738_v12 }
 0x140 PF: > { %s13_s12 = sadd.s32 1, %s988_s12  }
 0x141   : > { %p10_p4 = scmp.ge.s32.totalorder %s13_s12, 4  }
 0x143   :  { %12 = sbr.rel (!%p10_p4) target bundleno = 1 (0x1), region = 62 }

// kernel: ae_forward.17
= control target key start
LH: loop header
LB: loop body
LE: loop exit
PB: predicated region body
PF: predicated region fallthrough
CT: control target
= control target key end

     0   :  { %s921_s14 = smov 0   ;;  %s1122_s0 = inlined_call_operand.vmem [shape: bf16[512,144], index: 0, kind: input, shape index: {}]   ;;  %s1123_s1 = inlined_call_operand.vmem [shape: bf16[144,1], index: 1, kind: input, shape index: {}]   ;;  %s1124_s2 = inlined_call_operand.<no memory space> [shape: f32[1,1], index: 2, kind: input, shape index: {}]   ;;  %s1125_s3 = inlined_call_operand.vmem [shape: f32[512,1], index: 3, kind: output, shape index: {}]  }
   0x1   :  { %v8_v0 = vstv %s1124_s2 }
   0x2   :  { %9 = vst [vmem:[#allocation2] sm:$0x1] %v8_v0 }
   0x3 LB: > { %s734_s15 = sadd.s32 4294967295, %s895_s14   ;;  %p738_p0 = scmp.ge.s32.totalorder %s895_s14, 1  ;;  %s895_s14 = sphi %s921_s14, %s15_s14  }
   0x4   : > { %p141_p1 = scmp.lt.s32.totalorder %s895_s14, 3 }
   0x6   : > { %p142_p2 = pnand %p738_p0, %p141_p1 }
   0x7   : > { %v832_v1 = vld [vmem:[%s1123_s1] sm:$0xff] (!%p142_p2)   ;;  %v897_v2 = vmov (!%p142_p2), 0   ;;  %s739_s2 = sshll.u32 (!%p142_p2), %s734_s15, 5  ;;  %v833_v3 = vld [vmem:[%s1123_s1 + $0x8] sm:$0xff] (!%p142_p2)   ;;  %v834_v4 = vld [vmem:[%s1123_s1 + $0x10] sm:$0xff] (!%p142_p2)   ;;  %vm435_vm0 = vcmask (!%p142_p2), 130048  }
   0x8   : > { %145 = sbr.rel (%p142_p2) target bundleno = 317 (0x13d), region = 32  ;;  %484 = vmatprep.subr.bf16.mxu0 (!%p142_p2), %v897_v2  ;;  %805 = vmatprep.subr.bf16.mxu1 (!%p142_p2), %v897_v2  ;;  %p167_p3 = scmp.lt.s32.totalorder (!%p142_p2), %s739_s2, 63  ;;  %v835_v5 = vld [vmem:[%s1123_s1 + $0x18] sm:$0xff] (!%p142_p2)   ;;  %v836_v8 = vld [vmem:[%s1123_s1 + $0x20] sm:$0xff] (!%p142_p2)   ;;  %v837_v9 = vld [vmem:[%s1123_s1 + $0x28] sm:$0xff] (!%p142_p2)   ;;  %vm645_vm1 = vcmask (!%p142_p2), 7168  }
   0x9   : > { %485 = vmatpush1.bf16.msra.mxu0 (!%p142_p2), %v832_v1  ;;  %814 = vmatpush1.bf16.msra.mxu1 (!%p142_p2), %v832_v1  ;;  %v838_v10 = vld [vmem:[%s1123_s1 + $0x30] sm:$0xff] (!%p142_p2)   ;;  %v839_v11 = vld [vmem:[%s1123_s1 + $0x38] sm:$0xff] (!%p142_p2)   ;;  %v840_v12 = vld [vmem:[%s1123_s1 + $0x40] sm:$0xff] (!%p142_p2)  }
   0xa   : > { %486 = vmatprep.subr.bf16.mxu0 (!%p142_p2), %v897_v2  ;;  %806 = vmatprep.subr.bf16.mxu1 (!%p142_p2), %v897_v2  ;;  %v1014_v43 = vld [vmem:[#allocation2] ss:$0 sm:$0xff] (!%p142_p2) }
   0xd   : > { %487 = vmatpush1.bf16.msra.mxu0 (!%p142_p2), %v833_v3  ;;  %815 = vmatpush1.bf16.msra.mxu1 (!%p142_p2), %v833_v3 }
   0xe   : > { %488 = vmatprep.subr.bf16.mxu0 (!%p142_p2), %v897_v2  ;;  %807 = vmatprep.subr.bf16.mxu1 (!%p142_p2), %v897_v2 }
   0xf   : > { %s1127_s2 = smov (!%p167_p3, %s739_s2), 63 }
  0x10   : > { %s804_s22 = sshll.u32 %s1127_s2, 3 }
  0x11   : > { %s946_s25 = scalar_lea.vmem %s1122_s0, %s804_s22  ;;  %489 = vmatpush1.bf16.msra.mxu0 %v834_v4  ;;  %816 = vmatpush1.bf16.msra.mxu1 %v834_v4  ;;  %s1021_s13 = scalar_lea.vmem %s1125_s3, %s804_s22 }
  0x12   : > { %v843_v6 = vld [vmem:[%s946_s25 + $0x4] ss:$8 sps:$4 sm:$0xff]   ;;  %490 = vmatprep.subr.bf16.mxu0 %v897_v2  ;;  %808 = vmatprep.subr.bf16.mxu1 %v897_v2  ;;  %v841_v13 = vld [vmem:[%s946_s25] ss:$8 sps:$4 sm:$0xff]   ;;  %v847_v15 = vld [vmem:[%s946_s25 + $0x14] ss:$8 sps:$4 sm:$0xff]  }
  0x13   : > { %v846_v7 = vld [vmem:[%s946_s25 + $0x84] ss:$8 sps:$4 sm:$0xff]   ;;  %786 = vmatprep.mubr.msk.bf16.mxu0 %vm435_vm0, %v843_v6  ;;  %v844_v14 = vld [vmem:[%s946_s25 + $0x80] ss:$8 sps:$4 sm:$0xff]   ;;  %v849_v16 = vld [vmem:[%s946_s25 + $0x94] ss:$8 sps:$4 sm:$0xff]  }
  0x14   : > { %794 = vmatprep.mubr.msk.bf16.mxu1 %vm435_vm0, %v846_v7  ;;  %v851_v17 = vld [vmem:[%s946_s25 + $0x10] ss:$8 sps:$4 sm:$0xff]   ;;  %v853_v19 = vld [vmem:[%s946_s25 + $0x24] ss:$8 sps:$4 sm:$0xff]   ;;  %v857_v21 = vld [vmem:[%s946_s25 + $0x20] ss:$8 sps:$4 sm:$0xff]  }
  0x15   : > { %491 = vmatpush1.bf16.msra.mxu0 %v835_v5  ;;  %817 = vmatpush1.bf16.msra.mxu1 %v835_v5  ;;  %v852_v18 = vld [vmem:[%s946_s25 + $0x90] ss:$8 sps:$4 sm:$0xff]   ;;  %v855_v20 = vld [vmem:[%s946_s25 + $0xa4] ss:$8 sps:$4 sm:$0xff]   ;;  %v858_v22 = vld [vmem:[%s946_s25 + $0xa0] ss:$8 sps:$4 sm:$0xff]  }
  0x16   : > { %492 = vmatprep.subr.bf16.mxu0 %v897_v2  ;;  %809 = vmatprep.subr.bf16.mxu1 %v897_v2  ;;  %v859_v23 = vld [vmem:[%s946_s25 + $0x34] ss:$8 sps:$4 sm:$0xff]   ;;  %v863_v25 = vld [vmem:[%s946_s25 + $0x30] ss:$8 sps:$4 sm:$0xff]   ;;  %v865_v27 = vld [vmem:[%s946_s25 + $0x44] ss:$8 sps:$4 sm:$0xff]  }
  0x17   : > { %v861_v24 = vld [vmem:[%s946_s25 + $0xb4] ss:$8 sps:$4 sm:$0xff]   ;;  %v864_v26 = vld [vmem:[%s946_s25 + $0xb0] ss:$8 sps:$4 sm:$0xff]   ;;  %v867_v28 = vld [vmem:[%s946_s25 + $0xc4] ss:$8 sps:$4 sm:$0xff]  }
  0x18   : > { %v869_v29 = vld [vmem:[%s946_s25 + $0x40] ss:$8 sps:$4 sm:$0xff]   ;;  %v871_v31 = vld [vmem:[%s946_s25 + $0x54] ss:$8 sps:$4 sm:$0xff]   ;;  %v875_v33 = vld [vmem:[%s946_s25 + $0x50] ss:$8 sps:$4 sm:$0xff]  }
  0x19   : > { %493 = vmatpush1.bf16.msra.mxu0 %v836_v8  ;;  %818 = vmatpush1.bf16.msra.mxu1 %v836_v8  ;;  %v870_v30 = vld [vmem:[%s946_s25 + $0xc0] ss:$8 sps:$4 sm:$0xff]   ;;  %v873_v32 = vld [vmem:[%s946_s25 + $0xd4] ss:$8 sps:$4 sm:$0xff]   ;;  %v876_v34 = vld [vmem:[%s946_s25 + $0xd0] ss:$8 sps:$4 sm:$0xff]  }
  0x1a   : > { %494 = vmatprep.subr.bf16.mxu0 %v897_v2  ;;  %810 = vmatprep.subr.bf16.mxu1 %v897_v2  ;;  %v877_v35 = vld [vmem:[%s946_s25 + $0x64] ss:$8 sps:$4 sm:$0xff]   ;;  %v881_v37 = vld [vmem:[%s946_s25 + $0x60] ss:$8 sps:$4 sm:$0xff]   ;;  %v883_v39 = vld [vmem:[%s946_s25 + $0x74] ss:$8 sps:$4 sm:$0xff]  }
  0x1b   : > { %v879_v36 = vld [vmem:[%s946_s25 + $0xe4] ss:$8 sps:$4 sm:$0xff]   ;;  %v882_v38 = vld [vmem:[%s946_s25 + $0xe0] ss:$8 sps:$4 sm:$0xff]   ;;  %v885_v40 = vld [vmem:[%s946_s25 + $0xf4] ss:$8 sps:$4 sm:$0xff]  }
  0x1c   : > { %v887_v41 = vld [vmem:[%s946_s25 + $0x70] ss:$8 sps:$4 sm:$0xff]  }
  0x1d   : > { %495 = vmatpush1.bf16.msra.mxu0 %v837_v9  ;;  %819 = vmatpush1.bf16.msra.mxu1 %v837_v9  ;;  %v888_v42 = vld [vmem:[%s946_s25 + $0xf0] ss:$8 sps:$4 sm:$0xff]  }
  0x1e   : > { %496 = vmatprep.subr.bf16.mxu0 %v897_v2  ;;  %811 = vmatprep.subr.bf16.mxu1 %v897_v2 }
  0x21   : > { %497 = vmatpush1.bf16.msra.mxu0 %v838_v10  ;;  %820 = vmatpush1.bf16.msra.mxu1 %v838_v10 }
  0x22   : > { %498 = vmatprep.subr.bf16.mxu0 %v897_v2  ;;  %812 = vmatprep.subr.bf16.mxu1 %v897_v2 }
  0x25   : > { %499 = vmatpush1.bf16.msra.mxu0 %v839_v11  ;;  %821 = vmatpush1.bf16.msra.mxu1 %v839_v11 }
  0x26   : > { %500 = vmatprep.subr.bf16.mxu0 %v897_v2  ;;  %813 = vmatprep.subr.bf16.mxu1 %v897_v2 }
  0x29   : > { %501 = vmatpush1.bf16.msra.mxu0 %v840_v12  ;;  %822 = vmatpush1.bf16.msra.mxu1 %v840_v12 }
  0x2c   : > { %517 = vmatmul.mubr.bf16.vlgmr.msra.gmra.mrb[0].mxu0 %v841_v13  ;;  %581 = vmatmul.mubr.bf16.vlgmr.msra.gmra.mrb[0].mxu1 %v844_v14 }
  0x2d   : > { %787 = vmatprep.mubr.msk.bf16.mxu0 %vm435_vm0, %v847_v15  ;;  %795 = vmatprep.mubr.msk.bf16.mxu1 %vm435_vm0, %v849_v16 }
  0x34   : > { %525 = vmatmul.mubr.bf16.gmra.mrb[4].mxu0 %v851_v17  ;;  %589 = vmatmul.mubr.bf16.gmra.mrb[4].mxu1 %v852_v18 }
  0x35   : > { %788 = vmatprep.mubr.msk.bf16.mxu0 %vm435_vm0, %v853_v19  ;;  %796 = vmatprep.mubr.msk.bf16.mxu1 %vm435_vm0, %v855_v20 }
  0x3c   : > { %533 = vmatmul.mubr.bf16.gmra.mrb[8].mxu0 %v857_v21  ;;  %597 = vmatmul.mubr.bf16.gmra.mrb[8].mxu1 %v858_v22 }
  0x3d   : > { %789 = vmatprep.mubr.msk.bf16.mxu0 %vm435_vm0, %v859_v23  ;;  %797 = vmatprep.mubr.msk.bf16.mxu1 %vm435_vm0, %v861_v24 }
  0x44   : > { %541 = vmatmul.mubr.bf16.gmra.mrb[12].mxu0 %v863_v25  ;;  %605 = vmatmul.mubr.bf16.gmra.mrb[12].mxu1 %v864_v26 }
  0x45   : > { %790 = vmatprep.mubr.msk.bf16.mxu0 %vm435_vm0, %v865_v27  ;;  %798 = vmatprep.mubr.msk.bf16.mxu1 %vm435_vm0, %v867_v28 }
  0x4c   : > { %549 = vmatmul.mubr.bf16.gmra.mrb[16].mxu0 %v869_v29  ;;  %613 = vmatmul.mubr.bf16.gmra.mrb[16].mxu1 %v870_v30 }
  0x4d   : > { %791 = vmatprep.mubr.msk.bf16.mxu0 %vm435_vm0, %v871_v31  ;;  %799 = vmatprep.mubr.msk.bf16.mxu1 %vm435_vm0, %v873_v32 }
  0x54   : > { %557 = vmatmul.mubr.bf16.gmra.mrb[20].mxu0 %v875_v33  ;;  %621 = vmatmul.mubr.bf16.gmra.mrb[20].mxu1 %v876_v34 }
  0x55   : > { %792 = vmatprep.mubr.msk.bf16.mxu0 %vm435_vm0, %v877_v35  ;;  %800 = vmatprep.mubr.msk.bf16.mxu1 %vm435_vm0, %v879_v36 }
  0x5c   : > { %565 = vmatmul.mubr.bf16.gmra.mrb[24].mxu0 %v881_v37  ;;  %629 = vmatmul.mubr.bf16.gmra.mrb[24].mxu1 %v882_v38 }
  0x5d   : > { %793 = vmatprep.mubr.msk.bf16.mxu0 %vm435_vm0, %v883_v39  ;;  %801 = vmatprep.mubr.msk.bf16.mxu1 %vm435_vm0, %v885_v40 }
  0x64   : > { %573 = vmatmul.mubr.bf16.gmra.mrb[28].mxu0 %v887_v41  ;;  %637 = vmatmul.mubr.bf16.gmra.mrb[28].mxu1 %v888_v42 }
  0xff   : > { %v518_v44 = vpop.f32.mrb[0].mxu0  ;;  %v582_v45 = vpop.f32.mrb[0].mxu1 }
 0x100   : > { %v519_v46 = vadd.f32 %v1014_v43, %v518_v44  ;;  %v583_v47 = vadd.f32 %v1014_v43, %v582_v45  ;;  %v520_v48 = vpop.f32.mrb[1].mxu0  ;;  %v584_v49 = vpop.f32.mrb[1].mxu1 }
 0x101   : > { %v521_v50 = vpop.f32.mrb[2].mxu0  ;;  %v585_v51 = vpop.f32.mrb[2].mxu1 }
 0x102   : > { %646 = vst.msk [vmem:[%s1021_s13] sm:$0xff] %vm645_vm1, %v519_v46  ;;  %662 = vst.msk [vmem:[%s1021_s13 + $0x80] sm:$0xff] %vm645_vm1, %v583_v47  ;;  %v522_v52 = vadd.f32 %v1014_v43, %v521_v50  ;;  %v586_v53 = vadd.f32 %v1014_v43, %v585_v51  ;;  %v523_v54 = vpop.f32.mrb[3].mxu0  ;;  %v587_v55 = vpop.f32.mrb[3].mxu1 }
 0x104   : > { %647 = vst.msk [vmem:[%s1021_s13 + $0x8] sm:$0xff] %vm645_vm1, %v522_v52  ;;  %663 = vst.msk [vmem:[%s1021_s13 + $0x88] sm:$0xff] %vm645_vm1, %v586_v53 }
 0x107   : > { %v526_v56 = vpop.f32.mrb[4].mxu0  ;;  %v590_v57 = vpop.f32.mrb[4].mxu1 }
 0x108   : > { %v527_v58 = vadd.f32 %v1014_v43, %v526_v56  ;;  %v591_v59 = vadd.f32 %v1014_v43, %v590_v57  ;;  %v528_v60 = vpop.f32.mrb[5].mxu0  ;;  %v592_v61 = vpop.f32.mrb[5].mxu1 }
 0x109   : > { %v529_v62 = vpop.f32.mrb[6].mxu0  ;;  %v593_v63 = vpop.f32.mrb[6].mxu1 }
 0x10a   : > { %648 = vst.msk [vmem:[%s1021_s13 + $0x10] sm:$0xff] %vm645_vm1, %v527_v58  ;;  %664 = vst.msk [vmem:[%s1021_s13 + $0x90] sm:$0xff] %vm645_vm1, %v591_v59  ;;  %v530_v0 = vadd.f32 %v1014_v43, %v529_v62  ;;  %v594_v1 = vadd.f32 %v1014_v43, %v593_v63  ;;  %v531_v2 = vpop.f32.mrb[7].mxu0  ;;  %v595_v3 = vpop.f32.mrb[7].mxu1 }
 0x10c   : > { %649 = vst.msk [vmem:[%s1021_s13 + $0x18] sm:$0xff] %vm645_vm1, %v530_v0  ;;  %665 = vst.msk [vmem:[%s1021_s13 + $0x98] sm:$0xff] %vm645_vm1, %v594_v1 }
 0x10f   : > { %v534_v4 = vpop.f32.mrb[8].mxu0  ;;  %v598_v5 = vpop.f32.mrb[8].mxu1 }
 0x110   : > { %v535_v6 = vadd.f32 %v1014_v43, %v534_v4  ;;  %v599_v7 = vadd.f32 %v1014_v43, %v598_v5  ;;  %v536_v8 = vpop.f32.mrb[9].mxu0  ;;  %v600_v9 = vpop.f32.mrb[9].mxu1 }
 0x111   : > { %v537_v10 = vpop.f32.mrb[10].mxu0  ;;  %v601_v11 = vpop.f32.mrb[10].mxu1 }
 0x112   : > { %650 = vst.msk [vmem:[%s1021_s13 + $0x20] sm:$0xff] %vm645_vm1, %v535_v6  ;;  %666 = vst.msk [vmem:[%s1021_s13 + $0xa0] sm:$0xff] %vm645_vm1, %v599_v7  ;;  %v538_v12 = vadd.f32 %v1014_v43, %v537_v10  ;;  %v602_v13 = vadd.f32 %v1014_v43, %v601_v11  ;;  %v539_v14 = vpop.f32.mrb[11].mxu0  ;;  %v603_v15 = vpop.f32.mrb[11].mxu1 }
 0x114   : > { %651 = vst.msk [vmem:[%s1021_s13 + $0x28] sm:$0xff] %vm645_vm1, %v538_v12  ;;  %667 = vst.msk [vmem:[%s1021_s13 + $0xa8] sm:$0xff] %vm645_vm1, %v602_v13 }
 0x117   : > { %v542_v16 = vpop.f32.mrb[12].mxu0  ;;  %v606_v17 = vpop.f32.mrb[12].mxu1 }
 0x118   : > { %v543_v18 = vadd.f32 %v1014_v43, %v542_v16  ;;  %v607_v19 = vadd.f32 %v1014_v43, %v606_v17  ;;  %v544_v20 = vpop.f32.mrb[13].mxu0  ;;  %v608_v21 = vpop.f32.mrb[13].mxu1 }
 0x119   : > { %v545_v22 = vpop.f32.mrb[14].mxu0  ;;  %v609_v23 = vpop.f32.mrb[14].mxu1 }
 0x11a   : > { %652 = vst.msk [vmem:[%s1021_s13 + $0x30] sm:$0xff] %vm645_vm1, %v543_v18  ;;  %668 = vst.msk [vmem:[%s1021_s13 + $0xb0] sm:$0xff] %vm645_vm1, %v607_v19  ;;  %v546_v24 = vadd.f32 %v1014_v43, %v545_v22  ;;  %v610_v25 = vadd.f32 %v1014_v43, %v609_v23  ;;  %v547_v26 = vpop.f32.mrb[15].mxu0  ;;  %v611_v27 = vpop.f32.mrb[15].mxu1 }
 0x11c   : > { %653 = vst.msk [vmem:[%s1021_s13 + $0x38] sm:$0xff] %vm645_vm1, %v546_v24  ;;  %669 = vst.msk [vmem:[%s1021_s13 + $0xb8] sm:$0xff] %vm645_vm1, %v610_v25 }
 0x11f   : > { %v550_v28 = vpop.f32.mrb[16].mxu0  ;;  %v614_v29 = vpop.f32.mrb[16].mxu1 }
 0x120   : > { %v551_v30 = vadd.f32 %v1014_v43, %v550_v28  ;;  %v615_v31 = vadd.f32 %v1014_v43, %v614_v29  ;;  %v552_v32 = vpop.f32.mrb[17].mxu0  ;;  %v616_v33 = vpop.f32.mrb[17].mxu1 }
 0x121   : > { %v553_v34 = vpop.f32.mrb[18].mxu0  ;;  %v617_v35 = vpop.f32.mrb[18].mxu1 }
 0x122   : > { %654 = vst.msk [vmem:[%s1021_s13 + $0x40] sm:$0xff] %vm645_vm1, %v551_v30  ;;  %670 = vst.msk [vmem:[%s1021_s13 + $0xc0] sm:$0xff] %vm645_vm1, %v615_v31  ;;  %v554_v36 = vadd.f32 %v1014_v43, %v553_v34  ;;  %v618_v37 = vadd.f32 %v1014_v43, %v617_v35  ;;  %v555_v38 = vpop.f32.mrb[19].mxu0  ;;  %v619_v39 = vpop.f32.mrb[19].mxu1 }
 0x124   : > { %655 = vst.msk [vmem:[%s1021_s13 + $0x48] sm:$0xff] %vm645_vm1, %v554_v36  ;;  %671 = vst.msk [vmem:[%s1021_s13 + $0xc8] sm:$0xff] %vm645_vm1, %v618_v37 }
 0x127   : > { %v558_v40 = vpop.f32.mrb[20].mxu0  ;;  %v622_v41 = vpop.f32.mrb[20].mxu1 }
 0x128   : > { %v559_v42 = vadd.f32 %v1014_v43, %v558_v40  ;;  %v623_v44 = vadd.f32 %v1014_v43, %v622_v41  ;;  %v560_v45 = vpop.f32.mrb[21].mxu0  ;;  %v624_v46 = vpop.f32.mrb[21].mxu1 }
 0x129   : > { %v561_v47 = vpop.f32.mrb[22].mxu0  ;;  %v625_v48 = vpop.f32.mrb[22].mxu1 }
 0x12a   : > { %656 = vst.msk [vmem:[%s1021_s13 + $0x50] sm:$0xff] %vm645_vm1, %v559_v42  ;;  %672 = vst.msk [vmem:[%s1021_s13 + $0xd0] sm:$0xff] %vm645_vm1, %v623_v44  ;;  %v562_v49 = vadd.f32 %v1014_v43, %v561_v47  ;;  %v626_v50 = vadd.f32 %v1014_v43, %v625_v48  ;;  %v563_v51 = vpop.f32.mrb[23].mxu0  ;;  %v627_v52 = vpop.f32.mrb[23].mxu1 }
 0x12c   : > { %657 = vst.msk [vmem:[%s1021_s13 + $0x58] sm:$0xff] %vm645_vm1, %v562_v49  ;;  %673 = vst.msk [vmem:[%s1021_s13 + $0xd8] sm:$0xff] %vm645_vm1, %v626_v50 }
 0x12f   : > { %v566_v53 = vpop.f32.mrb[24].mxu0  ;;  %v630_v54 = vpop.f32.mrb[24].mxu1 }
 0x130   : > { %v567_v55 = vadd.f32 %v1014_v43, %v566_v53  ;;  %v631_v56 = vadd.f32 %v1014_v43, %v630_v54  ;;  %v568_v57 = vpop.f32.mrb[25].mxu0  ;;  %v632_v58 = vpop.f32.mrb[25].mxu1 }
 0x131   : > { %v569_v59 = vpop.f32.mrb[26].mxu0  ;;  %v633_v60 = vpop.f32.mrb[26].mxu1 }
 0x132   : > { %658 = vst.msk [vmem:[%s1021_s13 + $0x60] sm:$0xff] %vm645_vm1, %v567_v55  ;;  %674 = vst.msk [vmem:[%s1021_s13 + $0xe0] sm:$0xff] %vm645_vm1, %v631_v56  ;;  %v570_v61 = vadd.f32 %v1014_v43, %v569_v59  ;;  %v634_v62 = vadd.f32 %v1014_v43, %v633_v60  ;;  %v571_v63 = vpop.f32.mrb[27].mxu0  ;;  %v635_v0 = vpop.f32.mrb[27].mxu1 }
 0x134   : > { %659 = vst.msk [vmem:[%s1021_s13 + $0x68] sm:$0xff] %vm645_vm1, %v570_v61  ;;  %675 = vst.msk [vmem:[%s1021_s13 + $0xe8] sm:$0xff] %vm645_vm1, %v634_v62 }
 0x137   : > { %v574_v1 = vpop.f32.mrb[28].mxu0  ;;  %v638_v2 = vpop.f32.mrb[28].mxu1 }
 0x138   : > { %v575_v3 = vadd.f32 %v1014_v43, %v574_v1  ;;  %v639_v4 = vadd.f32 %v1014_v43, %v638_v2  ;;  %v576_v5 = vpop.f32.mrb[29].mxu0  ;;  %v640_v6 = vpop.f32.mrb[29].mxu1 }
 0x139   : > { %v577_v7 = vpop.f32.mrb[30].mxu0  ;;  %v641_v8 = vpop.f32.mrb[30].mxu1 }
 0x13a   : > { %660 = vst.msk [vmem:[%s1021_s13 + $0x70] sm:$0xff] %vm645_vm1, %v575_v3  ;;  %676 = vst.msk [vmem:[%s1021_s13 + $0xf0] sm:$0xff] %vm645_vm1, %v639_v4  ;;  %v578_v9 = vadd.f32 %v1014_v43, %v577_v7  ;;  %v642_v10 = vadd.f32 %v1014_v43, %v641_v8  ;;  %v579_v11 = vpop.f32.mrb[31].mxu0  ;;  %v643_v12 = vpop.f32.mrb[31].mxu1 }
 0x13c   : > { %661 = vst.msk [vmem:[%s1021_s13 + $0x78] sm:$0xff] %vm645_vm1, %v578_v9  ;;  %677 = vst.msk [vmem:[%s1021_s13 + $0xf8] sm:$0xff] %vm645_vm1, %v642_v10 }
 0x13d PF: > { %s15_s14 = sadd.s32 1, %s895_s14  }
 0x13e   : > { %p12_p4 = scmp.ge.s32.totalorder %s15_s14, 4  }
 0x140   :  { %14 = sbr.rel (!%p12_p4) target bundleno = 3 (0x3), region = 62 }

</bundles_post_ra>
